<compile_context>
chip_gen: v5e
topology: v5e:2x2
jax: 0.10.0
libtpu: 0.0.40
codegen_flags: <defaults>
</compile_context>

<pallas_src>
import functools

import jax
import jax.numpy as jnp
from jax import lax
from jax.experimental import pallas as pl
from jax.experimental.pallas import tpu as pltpu


_NEG_SLOPE = 0.01  # nn.LeakyReLU() default


def _adj_update_kernel(xi_ref, xj_ref, adj_ref, params_ref, out_ref, *,
                       layer_dims, col_offsets, n_nodes, bt):
    """One batch block: Bt batch elements, all pairs lane-dense."""
    N = n_nodes
    params = params_ref[...]                     # (max_out, total_cols) [W^T | b]

    # Pairwise |x_i - x_j| slab, already laid out (channels, Bt*N*N) by the
    # wrapper: column p = b*N*N + i*N + j.
    h = jnp.abs(xi_ref[...] - xj_ref[...])       # (D, Bt*N*N)

    # 1x1-conv stack (BN folded) as broadcasted VPU FMAs over K <= 16.
    n_layers = len(layer_dims) - 1
    for l in range(n_layers):
        cin, cout = layer_dims[l], layer_dims[l + 1]
        c0 = col_offsets[l]
        acc = params[0:cout, c0:c0 + 1] * h[0:1, :]              # (cout,1)*(1,P)
        for k in range(1, cin):
            acc = acc + params[0:cout, c0 + k:c0 + k + 1] * h[k:k + 1, :]
        acc = acc + params[0:cout, c0 + cin:c0 + cin + 1]        # bias column
        if l < n_layers - 1:
            h = jnp.maximum(acc, _NEG_SLOPE * acc)               # LeakyReLU, 2 ops
        else:
            h = acc                                              # last layer: no act

    # h: (1, Bt*N*N) logits. Regroup into (Bt*N, N) rows (row r = b*N + i).
    s = jnp.concatenate([h[:, r * N:(r + 1) * N] for r in range(bt * N)], axis=0)

    # Diagonal mask (-1e8 on j == i within each batch block), row softmax over j.
    row = lax.broadcasted_iota(jnp.int32, (bt * N, N), 0)
    col = lax.broadcasted_iota(jnp.int32, (bt * N, N), 1)
    s = jnp.where((row % N) == col, s - 1e8, s)
    m = jnp.max(s, axis=-1, keepdims=True)
    e = jnp.exp(s - m)
    denom = jnp.sum(e, axis=-1, keepdims=True)
    p = e / denom                                                # exact reciprocal

    out_ref[...] = adj_ref[...] - p


def _pack_params(ws, bs):
    """Pack the conv stack into one (max_out, sum(in_dim + 1)) f32 array.

    For layer l with weight (in, out) and bias (1, out):
      columns [c0 : c0+in]  hold W^T  (rows 0..out-1)
      column  [c0 + in]     holds the bias.
    """
    layer_dims = [ws[0].shape[0]] + [w.shape[1] for w in ws]
    max_out = max(layer_dims[1:])
    col_offsets, cols = [], 0
    for w in ws:
        col_offsets.append(cols)
        cols += w.shape[0] + 1
    packed = jnp.zeros((max_out, cols), jnp.float32)
    for l, (w, b) in enumerate(zip(ws, bs)):
        cin, cout = w.shape
        c0 = col_offsets[l]
        packed = packed.at[0:cout, c0:c0 + cin].set(w.T.astype(jnp.float32))
        packed = packed.at[0:cout, c0 + cin].set(b.reshape(-1).astype(jnp.float32))
    return packed, tuple(layer_dims), tuple(col_offsets)


@jax.jit
def adj_update(adj_before, x, ws, bs):
    B, N, D = x.shape
    packed, layer_dims, col_offsets = _pack_params(ws, bs)

    # Batch block size: the whole batch at small B (single grid step); otherwise
    # the largest divisor of B that is <= 32 (keeps intermediates well inside
    # default scoped VMEM on all generations).
    bt = B
    for cand in range(min(B, 32), 0, -1):
        if B % cand == 0:
            bt = cand
            break
    n_steps = B // bt
    P = N * N

    # Wrapper-side layout plumbing (pure gathers/broadcasts):
    #   xi_slab[d, b*N*N + i*N + j] = x[b, i, d]
    #   xj_slab[d, b*N*N + i*N + j] = x[b, j, d]
    x_dt = jnp.transpose(x, (2, 0, 1))                           # (D, B, N)
    xi_slab = jnp.repeat(x_dt, N, axis=2).reshape(D, B * P)      # (D, B*N*N)
    xj_slab = jnp.tile(x_dt, (1, 1, N)).reshape(D, B * P)        # (D, B*N*N)
    adj2 = adj_before.reshape(B * N, N)                          # contiguous slab

    kernel = functools.partial(_adj_update_kernel, layer_dims=layer_dims,
                               col_offsets=col_offsets, n_nodes=N, bt=bt)

    out = pl.pallas_call(
        kernel,
        out_shape=jax.ShapeDtypeStruct((B * N, N), jnp.float32),
        grid_spec=pltpu.PrefetchScalarGridSpec(
            num_scalar_prefetch=0,
            grid=(n_steps,),
            in_specs=[pl.BlockSpec((D, bt * P), lambda g: (0, g)),   # xi slab
                      pl.BlockSpec((D, bt * P), lambda g: (0, g)),   # xj slab
                      pl.BlockSpec((bt * N, N), lambda g: (g, 0)),   # adj slab
                      pl.BlockSpec(packed.shape, lambda g: (0, 0))], # params
            out_specs=pl.BlockSpec((bt * N, N), lambda g: (g, 0)),
        ),
        # Independent batch blocks; "parallel" is near-neutral vs "arbitrary"
        # and does NOT shard across v7x TensorCores (see CORE_PARALLEL TODO).
        compiler_params=pltpu.CompilerParams(
            dimension_semantics=("parallel",)),
    )(xi_slab, xj_slab, adj2, packed)

    return out.reshape(B, N, N)


def make_params(key, in_dim, nf_adj, ratio=(2, 2, 1, 1)):
    """Deterministic synthetic params for the distance_func conv stack.

    Conv layers: in_dim -> nf*2 -> nf*2 -> nf -> nf -> 1 (all 1x1).
    BatchNorm2d (eval mode, gamma=1/beta=0, running stats 0/1) is folded into
    the conv weight & bias.
    """
    dims = [in_dim] + [nf_adj * r for r in ratio] + [1]
    eps = 1e-5
    bn_scale = 1.0 / jnp.sqrt(1.0 + eps)
    ws, bs = [], []
    for i in range(len(dims) - 1):
        key, k1, k2 = jax.random.split(key, 3)
        bound = 1.0 / jnp.sqrt(float(dims[i]))
        w = jax.random.uniform(k1, (dims[i], dims[i + 1]), jnp.float32, -bound, bound)
        b = jax.random.uniform(k2, (1, dims[i + 1]), jnp.float32, -bound, bound)
        if i < len(dims) - 2:           # BN follows every conv except the last
            w = w * bn_scale
            b = b * bn_scale
        ws.append(w)
        bs.append(b)
    return ws, bs


def reference(adj_before, x, ws, bs):
    """Pure-JAX reference mirroring the PyTorch forward."""
    B, N, D = x.shape
    diff = jnp.abs(x[:, :, None, :] - x[:, None, :, :])          # (B, N, N, D)
    h = diff.reshape(B, N * N, D)
    for i in range(4):
        h = h @ ws[i] + bs[i]
        h = jnp.where(h > 0, h, _NEG_SLOPE * h)
    s = (h @ ws[4] + bs[4]).reshape(B, N, N)
    s = s - jnp.eye(N, dtype=s.dtype)[None] * 1e8
    p = jax.nn.softmax(s, axis=2)
    return adj_before - p


if __name__ == "__main__":
    B, N, D = 2, 16, 4        # batch, nodes, node feature dim
    nf_adj = 8                # args.nf_adj

    key = jax.random.PRNGKey(0)
    k_x, k_adj, k_p = jax.random.split(key, 3)
    x = jax.random.normal(k_x, (B, N, D), jnp.float32)
    adj_before = jax.random.normal(k_adj, (B, N, N), jnp.float32)
    ws, bs = make_params(k_p, D, nf_adj)

    out = adj_update(adj_before, x, ws, bs)
    jax.block_until_ready(out)

    ref = reference(adj_before, x, ws, bs)
    assert out.shape == (B, N, N)
    # Exact softmax reciprocal -> tight tolerance.
    assert jnp.allclose(out, ref, rtol=1e-4, atol=1e-4), "mismatch vs JAX reference"

    print("KERNEL_OK")
</pallas_src>

<mosaic_0001>
module attributes {stable_mosaic.version = 11 : i64} {
  func.func @_adj_update_kernel(%arg0: i32, %arg1: memref<4x512xf32, #tpu.memory_space<vmem>>, %arg2: memref<4x512xf32, #tpu.memory_space<vmem>>, %arg3: memref<32x16xf32, #tpu.memory_space<vmem>>, %arg4: memref<16x57xf32, #tpu.memory_space<vmem>>, %arg5: memref<32x16xf32, #tpu.memory_space<vmem>>) attributes {dimension_semantics = [#tpu.dimension_semantics<parallel>], iteration_bounds = array<i64: 1>, scalar_prefetch = 0 : i64, scratch_operands = 0 : i64, tpu.core_type = #tpu.core_type<tc>, window_params = [{transform_indices = @transform_0, window_bounds = array<i64: 4, 512>}, {transform_indices = @transform_1, window_bounds = array<i64: 4, 512>}, {transform_indices = @transform_2, window_bounds = array<i64: 32, 16>}, {pipeline_mode = #tpu.pipeline_mode<synchronous>, transform_indices = @transform_3, window_bounds = array<i64: 16, 57>}, {transform_indices = @transform_4, window_bounds = array<i64: 32, 16>}]} {
    %c0 = arith.constant 0 : index
    %c0_0 = arith.constant 0 : index
    %0 = vector.load %arg4[%c0, %c0_0] : memref<16x57xf32, #tpu.memory_space<vmem>>, vector<16x57xf32>
    %c0_1 = arith.constant 0 : index
    %c0_2 = arith.constant 0 : index
    %1 = vector.load %arg1[%c0_1, %c0_2] : memref<4x512xf32, #tpu.memory_space<vmem>>, vector<4x512xf32>
    %c0_3 = arith.constant 0 : index
    %c0_4 = arith.constant 0 : index
    %2 = vector.load %arg2[%c0_3, %c0_4] : memref<4x512xf32, #tpu.memory_space<vmem>>, vector<4x512xf32>
    %3 = arith.subf %1, %2 : vector<4x512xf32>
    %4 = math.absf %3 : vector<4x512xf32>
    %5 = vector.extract_strided_slice %0 {offsets = [0, 0], sizes = [16, 1], strides = [1, 1]} : vector<16x57xf32> to vector<16x1xf32>
    %6 = vector.extract_strided_slice %4 {offsets = [0, 0], sizes = [1, 512], strides = [1, 1]} : vector<4x512xf32> to vector<1x512xf32>
    %7 = vector.broadcast %5 : vector<16x1xf32> to vector<16x512xf32>
    %8 = vector.broadcast %6 : vector<1x512xf32> to vector<16x512xf32>
    %9 = arith.mulf %7, %8 : vector<16x512xf32>
    %10 = vector.extract_strided_slice %0 {offsets = [0, 1], sizes = [16, 1], strides = [1, 1]} : vector<16x57xf32> to vector<16x1xf32>
    %11 = vector.extract_strided_slice %4 {offsets = [1, 0], sizes = [1, 512], strides = [1, 1]} : vector<4x512xf32> to vector<1x512xf32>
    %12 = vector.broadcast %10 : vector<16x1xf32> to vector<16x512xf32>
    %13 = vector.broadcast %11 : vector<1x512xf32> to vector<16x512xf32>
    %14 = arith.mulf %12, %13 : vector<16x512xf32>
    %15 = arith.addf %9, %14 : vector<16x512xf32>
    %16 = vector.extract_strided_slice %0 {offsets = [0, 2], sizes = [16, 1], strides = [1, 1]} : vector<16x57xf32> to vector<16x1xf32>
    %17 = vector.extract_strided_slice %4 {offsets = [2, 0], sizes = [1, 512], strides = [1, 1]} : vector<4x512xf32> to vector<1x512xf32>
    %18 = vector.broadcast %16 : vector<16x1xf32> to vector<16x512xf32>
    %19 = vector.broadcast %17 : vector<1x512xf32> to vector<16x512xf32>
    %20 = arith.mulf %18, %19 : vector<16x512xf32>
    %21 = arith.addf %15, %20 : vector<16x512xf32>
    %22 = vector.extract_strided_slice %0 {offsets = [0, 3], sizes = [16, 1], strides = [1, 1]} : vector<16x57xf32> to vector<16x1xf32>
    %23 = vector.extract_strided_slice %4 {offsets = [3, 0], sizes = [1, 512], strides = [1, 1]} : vector<4x512xf32> to vector<1x512xf32>
    %24 = vector.broadcast %22 : vector<16x1xf32> to vector<16x512xf32>
    %25 = vector.broadcast %23 : vector<1x512xf32> to vector<16x512xf32>
    %26 = arith.mulf %24, %25 : vector<16x512xf32>
    %27 = arith.addf %21, %26 : vector<16x512xf32>
    %28 = vector.extract_strided_slice %0 {offsets = [0, 4], sizes = [16, 1], strides = [1, 1]} : vector<16x57xf32> to vector<16x1xf32>
    %29 = vector.broadcast %28 : vector<16x1xf32> to vector<16x512xf32>
    %30 = arith.addf %27, %29 : vector<16x512xf32>
    %cst = arith.constant 0.00999999977 : f32
    %31 = vector.broadcast %cst : f32 to vector<16x512xf32>
    %32 = arith.mulf %31, %30 : vector<16x512xf32>
    %33 = arith.maximumf %30, %32 : vector<16x512xf32>
    %34 = vector.extract_strided_slice %0 {offsets = [0, 5], sizes = [16, 1], strides = [1, 1]} : vector<16x57xf32> to vector<16x1xf32>
    %35 = vector.extract_strided_slice %33 {offsets = [0, 0], sizes = [1, 512], strides = [1, 1]} : vector<16x512xf32> to vector<1x512xf32>
    %36 = vector.broadcast %34 : vector<16x1xf32> to vector<16x512xf32>
    %37 = vector.broadcast %35 : vector<1x512xf32> to vector<16x512xf32>
    %38 = arith.mulf %36, %37 : vector<16x512xf32>
    %39 = vector.extract_strided_slice %0 {offsets = [0, 6], sizes = [16, 1], strides = [1, 1]} : vector<16x57xf32> to vector<16x1xf32>
    %40 = vector.extract_strided_slice %33 {offsets = [1, 0], sizes = [1, 512], strides = [1, 1]} : vector<16x512xf32> to vector<1x512xf32>
    %41 = vector.broadcast %39 : vector<16x1xf32> to vector<16x512xf32>
    %42 = vector.broadcast %40 : vector<1x512xf32> to vector<16x512xf32>
    %43 = arith.mulf %41, %42 : vector<16x512xf32>
    %44 = arith.addf %38, %43 : vector<16x512xf32>
    %45 = vector.extract_strided_slice %0 {offsets = [0, 7], sizes = [16, 1], strides = [1, 1]} : vector<16x57xf32> to vector<16x1xf32>
    %46 = vector.extract_strided_slice %33 {offsets = [2, 0], sizes = [1, 512], strides = [1, 1]} : vector<16x512xf32> to vector<1x512xf32>
    %47 = vector.broadcast %45 : vector<16x1xf32> to vector<16x512xf32>
    %48 = vector.broadcast %46 : vector<1x512xf32> to vector<16x512xf32>
    %49 = arith.mulf %47, %48 : vector<16x512xf32>
    %50 = arith.addf %44, %49 : vector<16x512xf32>
    %51 = vector.extract_strided_slice %0 {offsets = [0, 8], sizes = [16, 1], strides = [1, 1]} : vector<16x57xf32> to vector<16x1xf32>
    %52 = vector.extract_strided_slice %33 {offsets = [3, 0], sizes = [1, 512], strides = [1, 1]} : vector<16x512xf32> to vector<1x512xf32>
    %53 = vector.broadcast %51 : vector<16x1xf32> to vector<16x512xf32>
    %54 = vector.broadcast %52 : vector<1x512xf32> to vector<16x512xf32>
    %55 = arith.mulf %53, %54 : vector<16x512xf32>
    %56 = arith.addf %50, %55 : vector<16x512xf32>
    %57 = vector.extract_strided_slice %0 {offsets = [0, 9], sizes = [16, 1], strides = [1, 1]} : vector<16x57xf32> to vector<16x1xf32>
    %58 = vector.extract_strided_slice %33 {offsets = [4, 0], sizes = [1, 512], strides = [1, 1]} : vector<16x512xf32> to vector<1x512xf32>
    %59 = vector.broadcast %57 : vector<16x1xf32> to vector<16x512xf32>
    %60 = vector.broadcast %58 : vector<1x512xf32> to vector<16x512xf32>
    %61 = arith.mulf %59, %60 : vector<16x512xf32>
    %62 = arith.addf %56, %61 : vector<16x512xf32>
    %63 = vector.extract_strided_slice %0 {offsets = [0, 10], sizes = [16, 1], strides = [1, 1]} : vector<16x57xf32> to vector<16x1xf32>
    %64 = vector.extract_strided_slice %33 {offsets = [5, 0], sizes = [1, 512], strides = [1, 1]} : vector<16x512xf32> to vector<1x512xf32>
    %65 = vector.broadcast %63 : vector<16x1xf32> to vector<16x512xf32>
    %66 = vector.broadcast %64 : vector<1x512xf32> to vector<16x512xf32>
    %67 = arith.mulf %65, %66 : vector<16x512xf32>
    %68 = arith.addf %62, %67 : vector<16x512xf32>
    %69 = vector.extract_strided_slice %0 {offsets = [0, 11], sizes = [16, 1], strides = [1, 1]} : vector<16x57xf32> to vector<16x1xf32>
    %70 = vector.extract_strided_slice %33 {offsets = [6, 0], sizes = [1, 512], strides = [1, 1]} : vector<16x512xf32> to vector<1x512xf32>
    %71 = vector.broadcast %69 : vector<16x1xf32> to vector<16x512xf32>
    %72 = vector.broadcast %70 : vector<1x512xf32> to vector<16x512xf32>
    %73 = arith.mulf %71, %72 : vector<16x512xf32>
    %74 = arith.addf %68, %73 : vector<16x512xf32>
    %75 = vector.extract_strided_slice %0 {offsets = [0, 12], sizes = [16, 1], strides = [1, 1]} : vector<16x57xf32> to vector<16x1xf32>
    %76 = vector.extract_strided_slice %33 {offsets = [7, 0], sizes = [1, 512], strides = [1, 1]} : vector<16x512xf32> to vector<1x512xf32>
    %77 = vector.broadcast %75 : vector<16x1xf32> to vector<16x512xf32>
    %78 = vector.broadcast %76 : vector<1x512xf32> to vector<16x512xf32>
    %79 = arith.mulf %77, %78 : vector<16x512xf32>
    %80 = arith.addf %74, %79 : vector<16x512xf32>
    %81 = vector.extract_strided_slice %0 {offsets = [0, 13], sizes = [16, 1], strides = [1, 1]} : vector<16x57xf32> to vector<16x1xf32>
    %82 = vector.extract_strided_slice %33 {offsets = [8, 0], sizes = [1, 512], strides = [1, 1]} : vector<16x512xf32> to vector<1x512xf32>
    %83 = vector.broadcast %81 : vector<16x1xf32> to vector<16x512xf32>
    %84 = vector.broadcast %82 : vector<1x512xf32> to vector<16x512xf32>
    %85 = arith.mulf %83, %84 : vector<16x512xf32>
    %86 = arith.addf %80, %85 : vector<16x512xf32>
    %87 = vector.extract_strided_slice %0 {offsets = [0, 14], sizes = [16, 1], strides = [1, 1]} : vector<16x57xf32> to vector<16x1xf32>
    %88 = vector.extract_strided_slice %33 {offsets = [9, 0], sizes = [1, 512], strides = [1, 1]} : vector<16x512xf32> to vector<1x512xf32>
    %89 = vector.broadcast %87 : vector<16x1xf32> to vector<16x512xf32>
    %90 = vector.broadcast %88 : vector<1x512xf32> to vector<16x512xf32>
    %91 = arith.mulf %89, %90 : vector<16x512xf32>
    %92 = arith.addf %86, %91 : vector<16x512xf32>
    %93 = vector.extract_strided_slice %0 {offsets = [0, 15], sizes = [16, 1], strides = [1, 1]} : vector<16x57xf32> to vector<16x1xf32>
    %94 = vector.extract_strided_slice %33 {offsets = [10, 0], sizes = [1, 512], strides = [1, 1]} : vector<16x512xf32> to vector<1x512xf32>
    %95 = vector.broadcast %93 : vector<16x1xf32> to vector<16x512xf32>
    %96 = vector.broadcast %94 : vector<1x512xf32> to vector<16x512xf32>
    %97 = arith.mulf %95, %96 : vector<16x512xf32>
    %98 = arith.addf %92, %97 : vector<16x512xf32>
    %99 = vector.extract_strided_slice %0 {offsets = [0, 16], sizes = [16, 1], strides = [1, 1]} : vector<16x57xf32> to vector<16x1xf32>
    %100 = vector.extract_strided_slice %33 {offsets = [11, 0], sizes = [1, 512], strides = [1, 1]} : vector<16x512xf32> to vector<1x512xf32>
    %101 = vector.broadcast %99 : vector<16x1xf32> to vector<16x512xf32>
    %102 = vector.broadcast %100 : vector<1x512xf32> to vector<16x512xf32>
    %103 = arith.mulf %101, %102 : vector<16x512xf32>
    %104 = arith.addf %98, %103 : vector<16x512xf32>
    %105 = vector.extract_strided_slice %0 {offsets = [0, 17], sizes = [16, 1], strides = [1, 1]} : vector<16x57xf32> to vector<16x1xf32>
    %106 = vector.extract_strided_slice %33 {offsets = [12, 0], sizes = [1, 512], strides = [1, 1]} : vector<16x512xf32> to vector<1x512xf32>
    %107 = vector.broadcast %105 : vector<16x1xf32> to vector<16x512xf32>
    %108 = vector.broadcast %106 : vector<1x512xf32> to vector<16x512xf32>
    %109 = arith.mulf %107, %108 : vector<16x512xf32>
    %110 = arith.addf %104, %109 : vector<16x512xf32>
    %111 = vector.extract_strided_slice %0 {offsets = [0, 18], sizes = [16, 1], strides = [1, 1]} : vector<16x57xf32> to vector<16x1xf32>
    %112 = vector.extract_strided_slice %33 {offsets = [13, 0], sizes = [1, 512], strides = [1, 1]} : vector<16x512xf32> to vector<1x512xf32>
    %113 = vector.broadcast %111 : vector<16x1xf32> to vector<16x512xf32>
    %114 = vector.broadcast %112 : vector<1x512xf32> to vector<16x512xf32>
    %115 = arith.mulf %113, %114 : vector<16x512xf32>
    %116 = arith.addf %110, %115 : vector<16x512xf32>
    %117 = vector.extract_strided_slice %0 {offsets = [0, 19], sizes = [16, 1], strides = [1, 1]} : vector<16x57xf32> to vector<16x1xf32>
    %118 = vector.extract_strided_slice %33 {offsets = [14, 0], sizes = [1, 512], strides = [1, 1]} : vector<16x512xf32> to vector<1x512xf32>
    %119 = vector.broadcast %117 : vector<16x1xf32> to vector<16x512xf32>
    %120 = vector.broadcast %118 : vector<1x512xf32> to vector<16x512xf32>
    %121 = arith.mulf %119, %120 : vector<16x512xf32>
    %122 = arith.addf %116, %121 : vector<16x512xf32>
    %123 = vector.extract_strided_slice %0 {offsets = [0, 20], sizes = [16, 1], strides = [1, 1]} : vector<16x57xf32> to vector<16x1xf32>
    %124 = vector.extract_strided_slice %33 {offsets = [15, 0], sizes = [1, 512], strides = [1, 1]} : vector<16x512xf32> to vector<1x512xf32>
    %125 = vector.broadcast %123 : vector<16x1xf32> to vector<16x512xf32>
    %126 = vector.broadcast %124 : vector<1x512xf32> to vector<16x512xf32>
    %127 = arith.mulf %125, %126 : vector<16x512xf32>
    %128 = arith.addf %122, %127 : vector<16x512xf32>
    %129 = vector.extract_strided_slice %0 {offsets = [0, 21], sizes = [16, 1], strides = [1, 1]} : vector<16x57xf32> to vector<16x1xf32>
    %130 = vector.broadcast %129 : vector<16x1xf32> to vector<16x512xf32>
    %131 = arith.addf %128, %130 : vector<16x512xf32>
    %cst_5 = arith.constant 0.00999999977 : f32
    %132 = vector.broadcast %cst_5 : f32 to vector<16x512xf32>
    %133 = arith.mulf %132, %131 : vector<16x512xf32>
    %134 = arith.maximumf %131, %133 : vector<16x512xf32>
    %135 = vector.extract_strided_slice %0 {offsets = [0, 22], sizes = [8, 1], strides = [1, 1]} : vector<16x57xf32> to vector<8x1xf32>
    %136 = vector.extract_strided_slice %134 {offsets = [0, 0], sizes = [1, 512], strides = [1, 1]} : vector<16x512xf32> to vector<1x512xf32>
    %137 = vector.broadcast %135 : vector<8x1xf32> to vector<8x512xf32>
    %138 = vector.broadcast %136 : vector<1x512xf32> to vector<8x512xf32>
    %139 = arith.mulf %137, %138 : vector<8x512xf32>
    %140 = vector.extract_strided_slice %0 {offsets = [0, 23], sizes = [8, 1], strides = [1, 1]} : vector<16x57xf32> to vector<8x1xf32>
    %141 = vector.extract_strided_slice %134 {offsets = [1, 0], sizes = [1, 512], strides = [1, 1]} : vector<16x512xf32> to vector<1x512xf32>
    %142 = vector.broadcast %140 : vector<8x1xf32> to vector<8x512xf32>
    %143 = vector.broadcast %141 : vector<1x512xf32> to vector<8x512xf32>
    %144 = arith.mulf %142, %143 : vector<8x512xf32>
    %145 = arith.addf %139, %144 : vector<8x512xf32>
    %146 = vector.extract_strided_slice %0 {offsets = [0, 24], sizes = [8, 1], strides = [1, 1]} : vector<16x57xf32> to vector<8x1xf32>
    %147 = vector.extract_strided_slice %134 {offsets = [2, 0], sizes = [1, 512], strides = [1, 1]} : vector<16x512xf32> to vector<1x512xf32>
    %148 = vector.broadcast %146 : vector<8x1xf32> to vector<8x512xf32>
    %149 = vector.broadcast %147 : vector<1x512xf32> to vector<8x512xf32>
    %150 = arith.mulf %148, %149 : vector<8x512xf32>
    %151 = arith.addf %145, %150 : vector<8x512xf32>
    %152 = vector.extract_strided_slice %0 {offsets = [0, 25], sizes = [8, 1], strides = [1, 1]} : vector<16x57xf32> to vector<8x1xf32>
    %153 = vector.extract_strided_slice %134 {offsets = [3, 0], sizes = [1, 512], strides = [1, 1]} : vector<16x512xf32> to vector<1x512xf32>
    %154 = vector.broadcast %152 : vector<8x1xf32> to vector<8x512xf32>
    %155 = vector.broadcast %153 : vector<1x512xf32> to vector<8x512xf32>
    %156 = arith.mulf %154, %155 : vector<8x512xf32>
    %157 = arith.addf %151, %156 : vector<8x512xf32>
    %158 = vector.extract_strided_slice %0 {offsets = [0, 26], sizes = [8, 1], strides = [1, 1]} : vector<16x57xf32> to vector<8x1xf32>
    %159 = vector.extract_strided_slice %134 {offsets = [4, 0], sizes = [1, 512], strides = [1, 1]} : vector<16x512xf32> to vector<1x512xf32>
    %160 = vector.broadcast %158 : vector<8x1xf32> to vector<8x512xf32>
    %161 = vector.broadcast %159 : vector<1x512xf32> to vector<8x512xf32>
    %162 = arith.mulf %160, %161 : vector<8x512xf32>
    %163 = arith.addf %157, %162 : vector<8x512xf32>
    %164 = vector.extract_strided_slice %0 {offsets = [0, 27], sizes = [8, 1], strides = [1, 1]} : vector<16x57xf32> to vector<8x1xf32>
    %165 = vector.extract_strided_slice %134 {offsets = [5, 0], sizes = [1, 512], strides = [1, 1]} : vector<16x512xf32> to vector<1x512xf32>
    %166 = vector.broadcast %164 : vector<8x1xf32> to vector<8x512xf32>
    %167 = vector.broadcast %165 : vector<1x512xf32> to vector<8x512xf32>
    %168 = arith.mulf %166, %167 : vector<8x512xf32>
    %169 = arith.addf %163, %168 : vector<8x512xf32>
    %170 = vector.extract_strided_slice %0 {offsets = [0, 28], sizes = [8, 1], strides = [1, 1]} : vector<16x57xf32> to vector<8x1xf32>
    %171 = vector.extract_strided_slice %134 {offsets = [6, 0], sizes = [1, 512], strides = [1, 1]} : vector<16x512xf32> to vector<1x512xf32>
    %172 = vector.broadcast %170 : vector<8x1xf32> to vector<8x512xf32>
    %173 = vector.broadcast %171 : vector<1x512xf32> to vector<8x512xf32>
    %174 = arith.mulf %172, %173 : vector<8x512xf32>
    %175 = arith.addf %169, %174 : vector<8x512xf32>
    %176 = vector.extract_strided_slice %0 {offsets = [0, 29], sizes = [8, 1], strides = [1, 1]} : vector<16x57xf32> to vector<8x1xf32>
    %177 = vector.extract_strided_slice %134 {offsets = [7, 0], sizes = [1, 512], strides = [1, 1]} : vector<16x512xf32> to vector<1x512xf32>
    %178 = vector.broadcast %176 : vector<8x1xf32> to vector<8x512xf32>
    %179 = vector.broadcast %177 : vector<1x512xf32> to vector<8x512xf32>
    %180 = arith.mulf %178, %179 : vector<8x512xf32>
    %181 = arith.addf %175, %180 : vector<8x512xf32>
    %182 = vector.extract_strided_slice %0 {offsets = [0, 30], sizes = [8, 1], strides = [1, 1]} : vector<16x57xf32> to vector<8x1xf32>
    %183 = vector.extract_strided_slice %134 {offsets = [8, 0], sizes = [1, 512], strides = [1, 1]} : vector<16x512xf32> to vector<1x512xf32>
    %184 = vector.broadcast %182 : vector<8x1xf32> to vector<8x512xf32>
    %185 = vector.broadcast %183 : vector<1x512xf32> to vector<8x512xf32>
    %186 = arith.mulf %184, %185 : vector<8x512xf32>
    %187 = arith.addf %181, %186 : vector<8x512xf32>
    %188 = vector.extract_strided_slice %0 {offsets = [0, 31], sizes = [8, 1], strides = [1, 1]} : vector<16x57xf32> to vector<8x1xf32>
    %189 = vector.extract_strided_slice %134 {offsets = [9, 0], sizes = [1, 512], strides = [1, 1]} : vector<16x512xf32> to vector<1x512xf32>
    %190 = vector.broadcast %188 : vector<8x1xf32> to vector<8x512xf32>
    %191 = vector.broadcast %189 : vector<1x512xf32> to vector<8x512xf32>
    %192 = arith.mulf %190, %191 : vector<8x512xf32>
    %193 = arith.addf %187, %192 : vector<8x512xf32>
    %194 = vector.extract_strided_slice %0 {offsets = [0, 32], sizes = [8, 1], strides = [1, 1]} : vector<16x57xf32> to vector<8x1xf32>
    %195 = vector.extract_strided_slice %134 {offsets = [10, 0], sizes = [1, 512], strides = [1, 1]} : vector<16x512xf32> to vector<1x512xf32>
    %196 = vector.broadcast %194 : vector<8x1xf32> to vector<8x512xf32>
    %197 = vector.broadcast %195 : vector<1x512xf32> to vector<8x512xf32>
    %198 = arith.mulf %196, %197 : vector<8x512xf32>
    %199 = arith.addf %193, %198 : vector<8x512xf32>
    %200 = vector.extract_strided_slice %0 {offsets = [0, 33], sizes = [8, 1], strides = [1, 1]} : vector<16x57xf32> to vector<8x1xf32>
    %201 = vector.extract_strided_slice %134 {offsets = [11, 0], sizes = [1, 512], strides = [1, 1]} : vector<16x512xf32> to vector<1x512xf32>
    %202 = vector.broadcast %200 : vector<8x1xf32> to vector<8x512xf32>
    %203 = vector.broadcast %201 : vector<1x512xf32> to vector<8x512xf32>
    %204 = arith.mulf %202, %203 : vector<8x512xf32>
    %205 = arith.addf %199, %204 : vector<8x512xf32>
    %206 = vector.extract_strided_slice %0 {offsets = [0, 34], sizes = [8, 1], strides = [1, 1]} : vector<16x57xf32> to vector<8x1xf32>
    %207 = vector.extract_strided_slice %134 {offsets = [12, 0], sizes = [1, 512], strides = [1, 1]} : vector<16x512xf32> to vector<1x512xf32>
    %208 = vector.broadcast %206 : vector<8x1xf32> to vector<8x512xf32>
    %209 = vector.broadcast %207 : vector<1x512xf32> to vector<8x512xf32>
    %210 = arith.mulf %208, %209 : vector<8x512xf32>
    %211 = arith.addf %205, %210 : vector<8x512xf32>
    %212 = vector.extract_strided_slice %0 {offsets = [0, 35], sizes = [8, 1], strides = [1, 1]} : vector<16x57xf32> to vector<8x1xf32>
    %213 = vector.extract_strided_slice %134 {offsets = [13, 0], sizes = [1, 512], strides = [1, 1]} : vector<16x512xf32> to vector<1x512xf32>
    %214 = vector.broadcast %212 : vector<8x1xf32> to vector<8x512xf32>
    %215 = vector.broadcast %213 : vector<1x512xf32> to vector<8x512xf32>
    %216 = arith.mulf %214, %215 : vector<8x512xf32>
    %217 = arith.addf %211, %216 : vector<8x512xf32>
    %218 = vector.extract_strided_slice %0 {offsets = [0, 36], sizes = [8, 1], strides = [1, 1]} : vector<16x57xf32> to vector<8x1xf32>
    %219 = vector.extract_strided_slice %134 {offsets = [14, 0], sizes = [1, 512], strides = [1, 1]} : vector<16x512xf32> to vector<1x512xf32>
    %220 = vector.broadcast %218 : vector<8x1xf32> to vector<8x512xf32>
    %221 = vector.broadcast %219 : vector<1x512xf32> to vector<8x512xf32>
    %222 = arith.mulf %220, %221 : vector<8x512xf32>
    %223 = arith.addf %217, %222 : vector<8x512xf32>
    %224 = vector.extract_strided_slice %0 {offsets = [0, 37], sizes = [8, 1], strides = [1, 1]} : vector<16x57xf32> to vector<8x1xf32>
    %225 = vector.extract_strided_slice %134 {offsets = [15, 0], sizes = [1, 512], strides = [1, 1]} : vector<16x512xf32> to vector<1x512xf32>
    %226 = vector.broadcast %224 : vector<8x1xf32> to vector<8x512xf32>
    %227 = vector.broadcast %225 : vector<1x512xf32> to vector<8x512xf32>
    %228 = arith.mulf %226, %227 : vector<8x512xf32>
    %229 = arith.addf %223, %228 : vector<8x512xf32>
    %230 = vector.extract_strided_slice %0 {offsets = [0, 38], sizes = [8, 1], strides = [1, 1]} : vector<16x57xf32> to vector<8x1xf32>
    %231 = vector.broadcast %230 : vector<8x1xf32> to vector<8x512xf32>
    %232 = arith.addf %229, %231 : vector<8x512xf32>
    %cst_6 = arith.constant 0.00999999977 : f32
    %233 = vector.broadcast %cst_6 : f32 to vector<8x512xf32>
    %234 = arith.mulf %233, %232 : vector<8x512xf32>
    %235 = arith.maximumf %232, %234 : vector<8x512xf32>
    %236 = vector.extract_strided_slice %0 {offsets = [0, 39], sizes = [8, 1], strides = [1, 1]} : vector<16x57xf32> to vector<8x1xf32>
    %237 = vector.extract_strided_slice %235 {offsets = [0, 0], sizes = [1, 512], strides = [1, 1]} : vector<8x512xf32> to vector<1x512xf32>
    %238 = vector.broadcast %236 : vector<8x1xf32> to vector<8x512xf32>
    %239 = vector.broadcast %237 : vector<1x512xf32> to vector<8x512xf32>
    %240 = arith.mulf %238, %239 : vector<8x512xf32>
    %241 = vector.extract_strided_slice %0 {offsets = [0, 40], sizes = [8, 1], strides = [1, 1]} : vector<16x57xf32> to vector<8x1xf32>
    %242 = vector.extract_strided_slice %235 {offsets = [1, 0], sizes = [1, 512], strides = [1, 1]} : vector<8x512xf32> to vector<1x512xf32>
    %243 = vector.broadcast %241 : vector<8x1xf32> to vector<8x512xf32>
    %244 = vector.broadcast %242 : vector<1x512xf32> to vector<8x512xf32>
    %245 = arith.mulf %243, %244 : vector<8x512xf32>
    %246 = arith.addf %240, %245 : vector<8x512xf32>
    %247 = vector.extract_strided_slice %0 {offsets = [0, 41], sizes = [8, 1], strides = [1, 1]} : vector<16x57xf32> to vector<8x1xf32>
    %248 = vector.extract_strided_slice %235 {offsets = [2, 0], sizes = [1, 512], strides = [1, 1]} : vector<8x512xf32> to vector<1x512xf32>
    %249 = vector.broadcast %247 : vector<8x1xf32> to vector<8x512xf32>
    %250 = vector.broadcast %248 : vector<1x512xf32> to vector<8x512xf32>
    %251 = arith.mulf %249, %250 : vector<8x512xf32>
    %252 = arith.addf %246, %251 : vector<8x512xf32>
    %253 = vector.extract_strided_slice %0 {offsets = [0, 42], sizes = [8, 1], strides = [1, 1]} : vector<16x57xf32> to vector<8x1xf32>
    %254 = vector.extract_strided_slice %235 {offsets = [3, 0], sizes = [1, 512], strides = [1, 1]} : vector<8x512xf32> to vector<1x512xf32>
    %255 = vector.broadcast %253 : vector<8x1xf32> to vector<8x512xf32>
    %256 = vector.broadcast %254 : vector<1x512xf32> to vector<8x512xf32>
    %257 = arith.mulf %255, %256 : vector<8x512xf32>
    %258 = arith.addf %252, %257 : vector<8x512xf32>
    %259 = vector.extract_strided_slice %0 {offsets = [0, 43], sizes = [8, 1], strides = [1, 1]} : vector<16x57xf32> to vector<8x1xf32>
    %260 = vector.extract_strided_slice %235 {offsets = [4, 0], sizes = [1, 512], strides = [1, 1]} : vector<8x512xf32> to vector<1x512xf32>
    %261 = vector.broadcast %259 : vector<8x1xf32> to vector<8x512xf32>
    %262 = vector.broadcast %260 : vector<1x512xf32> to vector<8x512xf32>
    %263 = arith.mulf %261, %262 : vector<8x512xf32>
    %264 = arith.addf %258, %263 : vector<8x512xf32>
    %265 = vector.extract_strided_slice %0 {offsets = [0, 44], sizes = [8, 1], strides = [1, 1]} : vector<16x57xf32> to vector<8x1xf32>
    %266 = vector.extract_strided_slice %235 {offsets = [5, 0], sizes = [1, 512], strides = [1, 1]} : vector<8x512xf32> to vector<1x512xf32>
    %267 = vector.broadcast %265 : vector<8x1xf32> to vector<8x512xf32>
    %268 = vector.broadcast %266 : vector<1x512xf32> to vector<8x512xf32>
    %269 = arith.mulf %267, %268 : vector<8x512xf32>
    %270 = arith.addf %264, %269 : vector<8x512xf32>
    %271 = vector.extract_strided_slice %0 {offsets = [0, 45], sizes = [8, 1], strides = [1, 1]} : vector<16x57xf32> to vector<8x1xf32>
    %272 = vector.extract_strided_slice %235 {offsets = [6, 0], sizes = [1, 512], strides = [1, 1]} : vector<8x512xf32> to vector<1x512xf32>
    %273 = vector.broadcast %271 : vector<8x1xf32> to vector<8x512xf32>
    %274 = vector.broadcast %272 : vector<1x512xf32> to vector<8x512xf32>
    %275 = arith.mulf %273, %274 : vector<8x512xf32>
    %276 = arith.addf %270, %275 : vector<8x512xf32>
    %277 = vector.extract_strided_slice %0 {offsets = [0, 46], sizes = [8, 1], strides = [1, 1]} : vector<16x57xf32> to vector<8x1xf32>
    %278 = vector.extract_strided_slice %235 {offsets = [7, 0], sizes = [1, 512], strides = [1, 1]} : vector<8x512xf32> to vector<1x512xf32>
    %279 = vector.broadcast %277 : vector<8x1xf32> to vector<8x512xf32>
    %280 = vector.broadcast %278 : vector<1x512xf32> to vector<8x512xf32>
    %281 = arith.mulf %279, %280 : vector<8x512xf32>
    %282 = arith.addf %276, %281 : vector<8x512xf32>
    %283 = vector.extract_strided_slice %0 {offsets = [0, 47], sizes = [8, 1], strides = [1, 1]} : vector<16x57xf32> to vector<8x1xf32>
    %284 = vector.broadcast %283 : vector<8x1xf32> to vector<8x512xf32>
    %285 = arith.addf %282, %284 : vector<8x512xf32>
    %cst_7 = arith.constant 0.00999999977 : f32
    %286 = vector.broadcast %cst_7 : f32 to vector<8x512xf32>
    %287 = arith.mulf %286, %285 : vector<8x512xf32>
    %288 = arith.maximumf %285, %287 : vector<8x512xf32>
    %289 = vector.extract_strided_slice %0 {offsets = [0, 48], sizes = [1, 1], strides = [1, 1]} : vector<16x57xf32> to vector<1x1xf32>
    %290 = vector.extract_strided_slice %288 {offsets = [0, 0], sizes = [1, 512], strides = [1, 1]} : vector<8x512xf32> to vector<1x512xf32>
    %291 = vector.broadcast %289 : vector<1x1xf32> to vector<1x512xf32>
    %292 = arith.mulf %291, %290 : vector<1x512xf32>
    %293 = vector.extract_strided_slice %0 {offsets = [0, 49], sizes = [1, 1], strides = [1, 1]} : vector<16x57xf32> to vector<1x1xf32>
    %294 = vector.extract_strided_slice %288 {offsets = [1, 0], sizes = [1, 512], strides = [1, 1]} : vector<8x512xf32> to vector<1x512xf32>
    %295 = vector.broadcast %293 : vector<1x1xf32> to vector<1x512xf32>
    %296 = arith.mulf %295, %294 : vector<1x512xf32>
    %297 = arith.addf %292, %296 : vector<1x512xf32>
    %298 = vector.extract_strided_slice %0 {offsets = [0, 50], sizes = [1, 1], strides = [1, 1]} : vector<16x57xf32> to vector<1x1xf32>
    %299 = vector.extract_strided_slice %288 {offsets = [2, 0], sizes = [1, 512], strides = [1, 1]} : vector<8x512xf32> to vector<1x512xf32>
    %300 = vector.broadcast %298 : vector<1x1xf32> to vector<1x512xf32>
    %301 = arith.mulf %300, %299 : vector<1x512xf32>
    %302 = arith.addf %297, %301 : vector<1x512xf32>
    %303 = vector.extract_strided_slice %0 {offsets = [0, 51], sizes = [1, 1], strides = [1, 1]} : vector<16x57xf32> to vector<1x1xf32>
    %304 = vector.extract_strided_slice %288 {offsets = [3, 0], sizes = [1, 512], strides = [1, 1]} : vector<8x512xf32> to vector<1x512xf32>
    %305 = vector.broadcast %303 : vector<1x1xf32> to vector<1x512xf32>
    %306 = arith.mulf %305, %304 : vector<1x512xf32>
    %307 = arith.addf %302, %306 : vector<1x512xf32>
    %308 = vector.extract_strided_slice %0 {offsets = [0, 52], sizes = [1, 1], strides = [1, 1]} : vector<16x57xf32> to vector<1x1xf32>
    %309 = vector.extract_strided_slice %288 {offsets = [4, 0], sizes = [1, 512], strides = [1, 1]} : vector<8x512xf32> to vector<1x512xf32>
    %310 = vector.broadcast %308 : vector<1x1xf32> to vector<1x512xf32>
    %311 = arith.mulf %310, %309 : vector<1x512xf32>
    %312 = arith.addf %307, %311 : vector<1x512xf32>
    %313 = vector.extract_strided_slice %0 {offsets = [0, 53], sizes = [1, 1], strides = [1, 1]} : vector<16x57xf32> to vector<1x1xf32>
    %314 = vector.extract_strided_slice %288 {offsets = [5, 0], sizes = [1, 512], strides = [1, 1]} : vector<8x512xf32> to vector<1x512xf32>
    %315 = vector.broadcast %313 : vector<1x1xf32> to vector<1x512xf32>
    %316 = arith.mulf %315, %314 : vector<1x512xf32>
    %317 = arith.addf %312, %316 : vector<1x512xf32>
    %318 = vector.extract_strided_slice %0 {offsets = [0, 54], sizes = [1, 1], strides = [1, 1]} : vector<16x57xf32> to vector<1x1xf32>
    %319 = vector.extract_strided_slice %288 {offsets = [6, 0], sizes = [1, 512], strides = [1, 1]} : vector<8x512xf32> to vector<1x512xf32>
    %320 = vector.broadcast %318 : vector<1x1xf32> to vector<1x512xf32>
    %321 = arith.mulf %320, %319 : vector<1x512xf32>
    %322 = arith.addf %317, %321 : vector<1x512xf32>
    %323 = vector.extract_strided_slice %0 {offsets = [0, 55], sizes = [1, 1], strides = [1, 1]} : vector<16x57xf32> to vector<1x1xf32>
    %324 = vector.extract_strided_slice %288 {offsets = [7, 0], sizes = [1, 512], strides = [1, 1]} : vector<8x512xf32> to vector<1x512xf32>
    %325 = vector.broadcast %323 : vector<1x1xf32> to vector<1x512xf32>
    %326 = arith.mulf %325, %324 : vector<1x512xf32>
    %327 = arith.addf %322, %326 : vector<1x512xf32>
    %328 = vector.extract_strided_slice %0 {offsets = [0, 56], sizes = [1, 1], strides = [1, 1]} : vector<16x57xf32> to vector<1x1xf32>
    %329 = vector.broadcast %328 : vector<1x1xf32> to vector<1x512xf32>
    %330 = arith.addf %327, %329 : vector<1x512xf32>
    %331 = vector.extract_strided_slice %330 {offsets = [0, 0], sizes = [1, 16], strides = [1, 1]} : vector<1x512xf32> to vector<1x16xf32>
    %332 = vector.extract_strided_slice %330 {offsets = [0, 16], sizes = [1, 16], strides = [1, 1]} : vector<1x512xf32> to vector<1x16xf32>
    %333 = vector.extract_strided_slice %330 {offsets = [0, 32], sizes = [1, 16], strides = [1, 1]} : vector<1x512xf32> to vector<1x16xf32>
    %334 = vector.extract_strided_slice %330 {offsets = [0, 48], sizes = [1, 16], strides = [1, 1]} : vector<1x512xf32> to vector<1x16xf32>
    %335 = vector.extract_strided_slice %330 {offsets = [0, 64], sizes = [1, 16], strides = [1, 1]} : vector<1x512xf32> to vector<1x16xf32>
    %336 = vector.extract_strided_slice %330 {offsets = [0, 80], sizes = [1, 16], strides = [1, 1]} : vector<1x512xf32> to vector<1x16xf32>
    %337 = vector.extract_strided_slice %330 {offsets = [0, 96], sizes = [1, 16], strides = [1, 1]} : vector<1x512xf32> to vector<1x16xf32>
    %338 = vector.extract_strided_slice %330 {offsets = [0, 112], sizes = [1, 16], strides = [1, 1]} : vector<1x512xf32> to vector<1x16xf32>
    %339 = vector.extract_strided_slice %330 {offsets = [0, 128], sizes = [1, 16], strides = [1, 1]} : vector<1x512xf32> to vector<1x16xf32>
    %340 = vector.extract_strided_slice %330 {offsets = [0, 144], sizes = [1, 16], strides = [1, 1]} : vector<1x512xf32> to vector<1x16xf32>
    %341 = vector.extract_strided_slice %330 {offsets = [0, 160], sizes = [1, 16], strides = [1, 1]} : vector<1x512xf32> to vector<1x16xf32>
    %342 = vector.extract_strided_slice %330 {offsets = [0, 176], sizes = [1, 16], strides = [1, 1]} : vector<1x512xf32> to vector<1x16xf32>
    %343 = vector.extract_strided_slice %330 {offsets = [0, 192], sizes = [1, 16], strides = [1, 1]} : vector<1x512xf32> to vector<1x16xf32>
    %344 = vector.extract_strided_slice %330 {offsets = [0, 208], sizes = [1, 16], strides = [1, 1]} : vector<1x512xf32> to vector<1x16xf32>
    %345 = vector.extract_strided_slice %330 {offsets = [0, 224], sizes = [1, 16], strides = [1, 1]} : vector<1x512xf32> to vector<1x16xf32>
    %346 = vector.extract_strided_slice %330 {offsets = [0, 240], sizes = [1, 16], strides = [1, 1]} : vector<1x512xf32> to vector<1x16xf32>
    %347 = vector.extract_strided_slice %330 {offsets = [0, 256], sizes = [1, 16], strides = [1, 1]} : vector<1x512xf32> to vector<1x16xf32>
    %348 = vector.extract_strided_slice %330 {offsets = [0, 272], sizes = [1, 16], strides = [1, 1]} : vector<1x512xf32> to vector<1x16xf32>
    %349 = vector.extract_strided_slice %330 {offsets = [0, 288], sizes = [1, 16], strides = [1, 1]} : vector<1x512xf32> to vector<1x16xf32>
    %350 = vector.extract_strided_slice %330 {offsets = [0, 304], sizes = [1, 16], strides = [1, 1]} : vector<1x512xf32> to vector<1x16xf32>
    %351 = vector.extract_strided_slice %330 {offsets = [0, 320], sizes = [1, 16], strides = [1, 1]} : vector<1x512xf32> to vector<1x16xf32>
    %352 = vector.extract_strided_slice %330 {offsets = [0, 336], sizes = [1, 16], strides = [1, 1]} : vector<1x512xf32> to vector<1x16xf32>
    %353 = vector.extract_strided_slice %330 {offsets = [0, 352], sizes = [1, 16], strides = [1, 1]} : vector<1x512xf32> to vector<1x16xf32>
    %354 = vector.extract_strided_slice %330 {offsets = [0, 368], sizes = [1, 16], strides = [1, 1]} : vector<1x512xf32> to vector<1x16xf32>
    %355 = vector.extract_strided_slice %330 {offsets = [0, 384], sizes = [1, 16], strides = [1, 1]} : vector<1x512xf32> to vector<1x16xf32>
    %356 = vector.extract_strided_slice %330 {offsets = [0, 400], sizes = [1, 16], strides = [1, 1]} : vector<1x512xf32> to vector<1x16xf32>
    %357 = vector.extract_strided_slice %330 {offsets = [0, 416], sizes = [1, 16], strides = [1, 1]} : vector<1x512xf32> to vector<1x16xf32>
    %358 = vector.extract_strided_slice %330 {offsets = [0, 432], sizes = [1, 16], strides = [1, 1]} : vector<1x512xf32> to vector<1x16xf32>
    %359 = vector.extract_strided_slice %330 {offsets = [0, 448], sizes = [1, 16], strides = [1, 1]} : vector<1x512xf32> to vector<1x16xf32>
    %360 = vector.extract_strided_slice %330 {offsets = [0, 464], sizes = [1, 16], strides = [1, 1]} : vector<1x512xf32> to vector<1x16xf32>
    %361 = vector.extract_strided_slice %330 {offsets = [0, 480], sizes = [1, 16], strides = [1, 1]} : vector<1x512xf32> to vector<1x16xf32>
    %362 = vector.extract_strided_slice %330 {offsets = [0, 496], sizes = [1, 16], strides = [1, 1]} : vector<1x512xf32> to vector<1x16xf32>
    %363 = tpu.concatenate %331, %332, %333, %334, %335, %336, %337, %338, %339, %340, %341, %342, %343, %344, %345, %346 in 0 : vector<1x16xf32>, vector<1x16xf32>, vector<1x16xf32>, vector<1x16xf32>, vector<1x16xf32>, vector<1x16xf32>, vector<1x16xf32>, vector<1x16xf32>, vector<1x16xf32>, vector<1x16xf32>, vector<1x16xf32>, vector<1x16xf32>, vector<1x16xf32>, vector<1x16xf32>, vector<1x16xf32>, vector<1x16xf32> -> vector<16x16xf32>
    %364 = tpu.concatenate %347, %348, %349, %350, %351, %352, %353, %354, %355, %356, %357, %358, %359, %360, %361, %362 in 0 : vector<1x16xf32>, vector<1x16xf32>, vector<1x16xf32>, vector<1x16xf32>, vector<1x16xf32>, vector<1x16xf32>, vector<1x16xf32>, vector<1x16xf32>, vector<1x16xf32>, vector<1x16xf32>, vector<1x16xf32>, vector<1x16xf32>, vector<1x16xf32>, vector<1x16xf32>, vector<1x16xf32>, vector<1x16xf32> -> vector<16x16xf32>
    %365 = tpu.concatenate %363, %364 in 0 : vector<16x16xf32>, vector<16x16xf32> -> vector<32x16xf32>
    %366 = tpu.iota {dimensions = array<i32: 0>} : vector<32x16xi32>
    %367 = tpu.iota {dimensions = array<i32: 1>} : vector<32x16xi32>
    %c16_i32 = arith.constant 16 : i32
    %c0_i32 = arith.constant 0 : i32
    %368 = arith.cmpi eq, %c16_i32, %c0_i32 : i32
    %c1_i32 = arith.constant 1 : i32
    %369 = arith.select %368, %c1_i32, %c16_i32 : i32
    %370 = vector.broadcast %369 : i32 to vector<32x16xi32>
    %371 = arith.remsi %366, %370 : vector<32x16xi32>
    %c0_i32_8 = arith.constant 0 : i32
    %372 = vector.broadcast %c0_i32_8 : i32 to vector<32x16xi32>
    %373 = arith.cmpi ne, %371, %372 : vector<32x16xi32>
    %c0_i32_9 = arith.constant 0 : i32
    %374 = vector.broadcast %c0_i32_9 : i32 to vector<32x16xi32>
    %375 = arith.cmpi slt, %371, %374 : vector<32x16xi32>
    %c0_i32_10 = arith.constant 0 : i32
    %376 = arith.cmpi slt, %369, %c0_i32_10 : i32
    %377 = vector.broadcast %376 : i1 to vector<32x16xi1>
    %378 = vector.broadcast %377 : vector<32x16xi1> to vector<32x16xi1>
    %379 = arith.xori %375, %378 : vector<32x16xi1>
    %380 = arith.andi %379, %373 : vector<32x16xi1>
    %381 = vector.broadcast %369 : i32 to vector<32x16xi32>
    %382 = arith.addi %371, %381 : vector<32x16xi32>
    %383 = arith.select %380, %382, %371 : vector<32x16xi1>, vector<32x16xi32>
    %384 = arith.cmpi eq, %383, %367 : vector<32x16xi32>
    %cst_11 = arith.constant 1.000000e+08 : f32
    %385 = vector.broadcast %cst_11 : f32 to vector<32x16xf32>
    %386 = arith.subf %365, %385 : vector<32x16xf32>
    %387 = arith.select %384, %386, %365 : vector<32x16xi1>, vector<32x16xf32>
    %cst_12 = arith.constant dense<0xFF800000> : vector<32xf32>
    %388 = vector.multi_reduction <maximumf>, %387, %cst_12 [1] : vector<32x16xf32> to vector<32xf32>
    %389 = vector.shape_cast %388 : vector<32xf32> to vector<32x1xf32>
    %390 = vector.broadcast %389 : vector<32x1xf32> to vector<32x16xf32>
    %391 = arith.subf %387, %390 : vector<32x16xf32>
    %392 = math.exp %391 : vector<32x16xf32>
    %cst_13 = arith.constant dense<0.000000e+00> : vector<32xf32>
    %393 = vector.multi_reduction <add>, %392, %cst_13 [1] : vector<32x16xf32> to vector<32xf32>
    %394 = vector.shape_cast %393 : vector<32xf32> to vector<32x1xf32>
    %395 = vector.broadcast %394 : vector<32x1xf32> to vector<32x16xf32>
    %396 = arith.divf %392, %395 : vector<32x16xf32>
    %c0_14 = arith.constant 0 : index
    %c0_15 = arith.constant 0 : index
    %397 = vector.load %arg3[%c0_14, %c0_15] : memref<32x16xf32, #tpu.memory_space<vmem>>, vector<32x16xf32>
    %398 = arith.subf %397, %396 : vector<32x16xf32>
    %c0_16 = arith.constant 0 : index
    %c0_17 = arith.constant 0 : index
    %399 = vector.load %arg5[%c0_16, %c0_17] : memref<32x16xf32, #tpu.memory_space<vmem>>, vector<32x16xf32>
    tpu.vector_store %arg5[%c0_16, %c0_17], %398 {strides = array<i32>} : memref<32x16xf32, #tpu.memory_space<vmem>>, vector<32x16xf32>,
    return
  }
  func.func @transform_0(%arg0: i32) -> (i32, i32) {
    %c0_i32 = arith.constant 0 : i32
    %c0_i32_0 = arith.constant 0 : i32
    return %c0_i32, %arg0 : i32, i32
  }
  func.func @transform_1(%arg0: i32) -> (i32, i32) {
    %c0_i32 = arith.constant 0 : i32
    %c0_i32_0 = arith.constant 0 : i32
    return %c0_i32, %arg0 : i32, i32
  }
  func.func @transform_2(%arg0: i32) -> (i32, i32) {
    %c0_i32 = arith.constant 0 : i32
    %c0_i32_0 = arith.constant 0 : i32
    return %arg0, %c0_i32 : i32, i32
  }
  func.func @transform_3(%arg0: i32) -> (i32, i32) {
    %c0_i32 = arith.constant 0 : i32
    %c0_i32_0 = arith.constant 0 : i32
    %c0_i32_1 = arith.constant 0 : i32
    return %c0_i32, %c0_i32_0 : i32, i32
  }
  func.func @transform_4(%arg0: i32) -> (i32, i32) {
    %c0_i32 = arith.constant 0 : i32
    %c0_i32_0 = arith.constant 0 : i32
    return %arg0, %c0_i32 : i32, i32
  }
}

</mosaic_0001>

<bundles_post_ra>
// kernel: adj_update.1
= control target key start
LH: loop header
LB: loop body
LE: loop exit
PB: predicated region body
PF: predicated region fallthrough
CT: control target
= control target key end

     0   :  { %v1776_v1 = vmov 2   ;;  %v1777_v2 = vmov 1   ;;  %s2710_s0 = inlined_call_operand.vmem [shape: f32[4,512], index: 0, kind: input, shape index: {}]   ;;  %s2711_s1 = inlined_call_operand.vmem [shape: f32[4,512], index: 1, kind: input, shape index: {}]   ;;  %s2712_s2 = inlined_call_operand.vmem [shape: f32[32,16], index: 2, kind: input, shape index: {}]   ;;  %s2713_s3 = inlined_call_operand.vmem [shape: f32[16,57], index: 3, kind: input, shape index: {}]   ;;  %s2714_s4 = inlined_call_operand.hbm [shape: f32[32,16], index: 4, kind: output, shape index: {}]  }
   0x1   :  { %v1871_v0 = vld [vmem:[%s2713_s3] sm:$0xff]  ;;  %1658 = vset.pattern.permute.xlu2 %v1776_v1  ;;  %1657 = vset.pattern.permute.xlu1 %v1777_v2 }
   0x2   :  { %9 = vsyncpa [#allocation3], 0  ;;  %v1778_v3 = vmov 0   ;;  %97 = vperm.xlu2 %1658, %v1871_v0   ;;  %61 = vperm.xlu1 %1657, %v1871_v0   ;;  %v1879_v4 = vld [vmem:[%s2713_s3 + $0x8] sm:$0xff]  ;;  %v1779_v5 = vmov 4   ;;  %v1780_v6 = vmov 3  }
   0x3   :  { %1656 = vset.pattern.permute.xlu0 %v1778_v3  ;;  %v1781_v7 = vmov 5   ;;  %v1782_v8 = vmov 6   ;;  %v1783_v9 = vmov 8   ;;  %v1784_v10 = vmov 7   ;;  %v20_v21 = vld [vmem:[%s2710_s0] sm:$0xff]  ;;  %v21_v22 = vld [vmem:[%s2710_s0 + $0x8] sm:$0xff] }
   0x4   :  { %30 = vperm.xlu0 %1656, %v1871_v0   ;;  %v1785_v11 = vmov 10   ;;  %v1786_v12 = vmov 9   ;;  %v1787_v13 = vmov 13   ;;  %v1788_v14 = vmov 15   ;;  %v22_v23 = vld [vmem:[%s2711_s1] sm:$0xff]  ;;  %v23_v24 = vld [vmem:[%s2711_s1 + $0x8] sm:$0xff] }
   0x5   :  { %v1789_v15 = vmov 11   ;;  %v1790_v16 = vmov 18   ;;  %v1791_v17 = vmov 12   ;;  %v1792_v18 = vmov 20   ;;  %s1834_s27 = smov 96   ;;  %s1835_s28 = smov 80  }
   0x6   :  { %v1793_v20 = vmov 14   ;;  %v1794_v26 = vmov 24   ;;  %v24_v27 = vsub.f32 %v20_v21, %v22_v23  ;;  %v25_v28 = vsub.f32 %v21_v22, %v23_v24  ;;  %s1836_s29 = smov 64   ;;  %s1837_s30 = smov 48  }
   0x7   :  { %v1795_v44 = vmov 16   ;;  %v1796_v53 = vmov 29   ;;  %s1838_s5 = smov 32   ;;  %s1839_s6 = smov 16   ;;  %vm1298_vm0 = vcmask 1040384   ;;  %vm1300_vm1 = vcmask 1041408  }
   0x8   :  { %v1929_v29 = vand.u32 2147483647, %v24_v27  ;;  %v1931_v30 = vand.u32 2147483647, %v25_v28  ;;  %vm1302_vm2 = vcmask 1042432   ;;  %vm1304_vm3 = vcmask 1043456  }
   0x9   :  { %vm1306_vm4 = vcmask 1044480   ;;  %vm1310_vm5 = vcmask 1046528   ;;  %vm1308_vm6 = vcmask 1045504   ;;  %vm1458_vm8 = vcmask 130048   ;;  %s1840_s13 = smov [#allocation2]   ;;  %s1573_s17 = sshll.u32 %s2714_s4, 4  ;;  %s1574_s17 = int_to_ptr.hbm [resolvable:$true] %s1573_s17 }
   0xa   :  { %101 = vperm.xlu2 %1658, %v1879_v4   ;;  %65 = vperm.xlu1 %1657, %v1879_v4   ;;  %v104_v31 = vperm.slane %v1929_v29, 2  ;;  %v105_v32 = vperm.slane %v1929_v29, 6  ;;  %v106_v33 = vperm.slane %v1931_v30, 2  ;;  %v107_v34 = vperm.slane %v1931_v30, 6  ;;  %s1571_s14 = sshll.u32 %s1840_s13, 4  ;;  %s1841_s20 = smov 128   ;;  %s1572_s14 = int_to_ptr.vmem [resolvable:$true] %s1571_s14 }
   0xb   :  { %v68_v36 = vperm.slane %v1929_v29, 1  ;;  %v69_v37 = vperm.slane %v1929_v29, 5  ;;  %v70_v38 = vperm.slane %v1931_v30, 1  ;;  %v71_v39 = vperm.slane %v1931_v30, 5  ;;  %s1842_s21 = smov 8  }
   0xc   :  { %35 = vperm.xlu0 %1656, %v1879_v4   ;;  %v40_v40 = vperm.slane %v1929_v29, 0  ;;  %v41_v41 = vperm.slane %v1929_v29, 4  ;;  %v42_v42 = vperm.slane %v1931_v30, 0  ;;  %v43_v43 = vperm.slane %v1931_v30, 4 }
   0xd   :  { %v1947_v45 = vperm.slane %v104_v31, 2  ;;  %v1949_v46 = vperm.slane %v105_v32, 2  ;;  %v1951_v47 = vperm.slane %v106_v33, 2  ;;  %v1953_v48 = vperm.slane %v107_v34, 2 }
   0xe   :  { %v76_v49 = vperm.slane %v68_v36, 1  ;;  %v77_v50 = vperm.slane %v69_v37, 1  ;;  %v78_v51 = vperm.slane %v70_v38, 1  ;;  %v79_v52 = vperm.slane %v71_v39, 1 }
   0xf   :  { %v48_v54 = vperm.slane %v40_v40, 0  ;;  %v49_v55 = vperm.slane %v41_v41, 0  ;;  %v50_v56 = vperm.slane %v42_v42, 0  ;;  %v51_v57 = vperm.slane %v43_v43, 0 }
  0x10   :  { %v140_v22 = vperm.slane %v1929_v29, 3  ;;  %v142_v27 = vperm.slane %v1931_v30, 3  ;;  %v143_v28 = vperm.slane %v1931_v30, 7  ;;  %v1798_v36 = vmov 34  }
  0x12   :  { %1661 = vset.pattern.permute.xlu2 %v1779_v5  ;;  %1660 = vset.pattern.permute.xlu1 %v1780_v6 }
  0x13   :  { %169 = vperm.xlu2 %1661, %v1871_v0   ;;  %137 = vperm.xlu1 %1660, %v1879_v4  }
  0x14   :  { %1659 = vset.pattern.permute.xlu0 %v1780_v6 }
  0x15   :  { %133 = vperm.xlu0 %1659, %v1871_v0  }
  0x1b   :  { %1663 = vset.pattern.permute.xlu2 %v1781_v7  ;;  %1662 = vset.pattern.permute.xlu1 %v1779_v5 }
  0x1c   :  { %201 = vperm.xlu2 %1663, %v1871_v0   ;;  %173 = vperm.xlu1 %1662, %v1879_v4  }
  0x1d   :  { %1664 = vset.pattern.permute.xlu0 %v1781_v7 }
  0x1e   :  { %205 = vperm.xlu0 %1664, %v1879_v4  }
  0x24   :  { %1666 = vset.pattern.permute.xlu2 %v1782_v8  ;;  %1665 = vset.pattern.permute.xlu1 %v1782_v8 }
  0x25   :  { %225 = vperm.xlu2 %1666, %v1879_v4   ;;  %221 = vperm.xlu1 %1665, %v1871_v0  }
  0x26   :  { %1669 = vset.pattern.permute.xlu0 %v1783_v9 }
  0x27   :  { %277 = vperm.xlu0 %1669, %v1871_v0  }
  0x2d   :  { %1668 = vset.pattern.permute.xlu2 %v1784_v10  ;;  %1667 = vset.pattern.permute.xlu1 %v1784_v10 }
  0x2e   :  { %253 = vperm.xlu2 %1668, %v1879_v4   ;;  %249 = vperm.xlu1 %1667, %v1871_v0  }
  0x2f   :  { %1674 = vset.pattern.permute.xlu0 %v1785_v11 }
  0x30   :  { %337 = vperm.xlu0 %1674, %v1879_v4  }
  0x36   :  { %1671 = vset.pattern.permute.xlu2 %v1786_v12  ;;  %1670 = vset.pattern.permute.xlu1 %v1783_v9 }
  0x37   :  { %305 = vperm.xlu2 %1671, %v1871_v0   ;;  %281 = vperm.xlu1 %1670, %v1879_v4  }
  0x38   :  { %1679 = vset.pattern.permute.xlu0 %v1787_v13 }
  0x39   :  { %417 = vperm.xlu0 %1679, %v1871_v0  }
  0x3f   :  { %1673 = vset.pattern.permute.xlu2 %v1785_v11  ;;  %1672 = vset.pattern.permute.xlu1 %v1786_v12 }
  0x40   :  { %333 = vperm.xlu2 %1673, %v1871_v0   ;;  %309 = vperm.xlu1 %1672, %v1879_v4  }
  0x41   :  { %1684 = vset.pattern.permute.xlu0 %v1788_v14 }
  0x42   :  { %477 = vperm.xlu0 %1684, %v1879_v4  }
  0x48   :  { %1676 = vset.pattern.permute.xlu2 %v1789_v15  ;;  %1675 = vset.pattern.permute.xlu1 %v1789_v15  ;;  %v1797_v15 = vmov 17  }
  0x49   :  { %365 = vperm.xlu2 %1676, %v1879_v4   ;;  %361 = vperm.xlu1 %1675, %v1871_v0  }
  0x4a   :  { %1689 = vset.pattern.permute.xlu0 %v1790_v16 }
  0x4b   :  { %557 = vperm.xlu0 %1689, %v1871_v0  }
  0x51   :  { %1678 = vset.pattern.permute.xlu2 %v1791_v17  ;;  %1677 = vset.pattern.permute.xlu1 %v1791_v17 }
  0x52   :  { %393 = vperm.xlu2 %1678, %v1879_v4   ;;  %389 = vperm.xlu1 %1677, %v1871_v0  }
  0x53   :  { %1694 = vset.pattern.permute.xlu0 %v1792_v18 }
  0x54   :  { %617 = vperm.xlu0 %1694, %v1879_v4  }
  0x5a   :  { %1681 = vset.pattern.permute.xlu2 %v1793_v20  ;;  %1680 = vset.pattern.permute.xlu1 %v1787_v13 }
  0x5b   :  { %445 = vperm.xlu2 %1681, %v1871_v0   ;;  %421 = vperm.xlu1 %1680, %v1879_v4  }
  0x5c   :  { %v98_v19 = vpop.permute.xlu2 %97  ;;  %1699 = vset.pattern.permute.xlu0 %v1794_v26  ;;  %v141_v26 = vperm.slane %v1929_v29, 7 }
  0x5d   :  { %701 = vperm.xlu0 %1699, %v1871_v0   ;;  %v116_v58 = vmul.f32 %v1947_v45, %v98_v19  ;;  %v117_v59 = vmul.f32 %v1949_v46, %v98_v19  ;;  %v118_v60 = vmul.f32 %v1951_v47, %v98_v19  ;;  %v119_v61 = vmul.f32 %v1953_v48, %v98_v19 }
  0x63   :  { %1683 = vset.pattern.permute.xlu2 %v1788_v14  ;;  %1682 = vset.pattern.permute.xlu1 %v1793_v20 }
  0x64   :  { %v1924_v25 = vpop.permute.xlu2 %101  ;;  %473 = vperm.xlu2 %1683, %v1871_v0   ;;  %449 = vperm.xlu1 %1682, %v1879_v4  }
  0x65   :  { %1704 = vset.pattern.permute.xlu0 %v1796_v53  ;;  %v120_v41 = vmul.f32 %v1947_v45, %v1924_v25  ;;  %v121_v29 = vmul.f32 %v1949_v46, %v1924_v25  ;;  %v122_v30 = vmul.f32 %v1951_v47, %v1924_v25  ;;  %v148_v53 = vperm.slane %v140_v22, 3 }
  0x66   :  { %781 = vperm.xlu0 %1704, %v1871_v0   ;;  %v150_v45 = vperm.slane %v142_v27, 3  ;;  %v151_v46 = vperm.slane %v143_v28, 3 }
  0x6c   :  { %1686 = vset.pattern.permute.xlu2 %v1795_v44  ;;  %1685 = vset.pattern.permute.xlu1 %v1795_v44 }
  0x6d   :  { %v1937_v35 = vpop.permute.xlu2 %169  ;;  %505 = vperm.xlu2 %1686, %v1879_v4   ;;  %501 = vperm.xlu1 %1685, %v1871_v0  }
  0x6e   :  { %1709 = vset.pattern.permute.xlu0 %v1798_v36 }
  0x6f   :  { %861 = vperm.xlu0 %1709, %v1871_v0  }
  0x74   :  { %v62_v62 = vpop.permute.xlu1 %61 }
  0x75   :  { %v80_v1 = vmul.f32 %v76_v49, %v62_v62  ;;  %v81_v2 = vmul.f32 %v77_v50, %v62_v62  ;;  %v82_v3 = vmul.f32 %v78_v51, %v62_v62  ;;  %v83_v5 = vmul.f32 %v79_v52, %v62_v62  ;;  %1688 = vset.pattern.permute.xlu2 %v1797_v15 }
  0x76   :  { %v31_v63 = vpop.permute.xlu0 %30  ;;  %v1962_v10 = vpop.permute.xlu2 %201  ;;  %1687 = vset.pattern.permute.xlu1 %v1797_v15  ;;  %533 = vperm.xlu2 %1688, %v1879_v4  }
  0x77   :  { %v52_v6 = vmul.f32 %v48_v54, %v31_v63  ;;  %v53_v7 = vmul.f32 %v49_v55, %v31_v63  ;;  %v54_v8 = vmul.f32 %v50_v56, %v31_v63  ;;  %v55_v9 = vmul.f32 %v51_v57, %v31_v63  ;;  %529 = vperm.xlu1 %1687, %v1871_v0  }
  0x79   :  { %v88_v11 = vadd.f32 %v80_v1, %v52_v6  ;;  %v89_v12 = vadd.f32 %v81_v2, %v53_v7  ;;  %v90_v13 = vadd.f32 %v82_v3, %v54_v8  ;;  %v91_v14 = vadd.f32 %v83_v5, %v55_v9 }
  0x7b   :  { %v124_v17 = vadd.f32 %v116_v58, %v88_v11  ;;  %v125_v19 = vadd.f32 %v117_v59, %v89_v12  ;;  %v126_v20 = vadd.f32 %v118_v60, %v90_v13  ;;  %v127_v21 = vadd.f32 %v119_v61, %v91_v14 }
  0x7c   :  { %v66_v23 = vpop.permute.xlu1 %65 }
  0x7d   :  { %v84_v31 = vmul.f32 %v76_v49, %v66_v23  ;;  %v85_v32 = vmul.f32 %v77_v50, %v66_v23  ;;  %v86_v33 = vmul.f32 %v78_v51, %v66_v23  ;;  %v87_v34 = vmul.f32 %v79_v52, %v66_v23 }
  0x7e   :  { %v36_v24 = vpop.permute.xlu0 %35  ;;  %v123_v51 = vmul.f32 %v1953_v48, %v1924_v25  ;;  %v1799_v52 = vmov 19  }
  0x7f   :  { %v56_v37 = vmul.f32 %v48_v54, %v36_v24  ;;  %v57_v38 = vmul.f32 %v49_v55, %v36_v24  ;;  %v58_v39 = vmul.f32 %v50_v56, %v36_v24  ;;  %v59_v40 = vmul.f32 %v51_v57, %v36_v24  ;;  %v1977_v50 = vpop.permute.xlu2 %225  ;;  %1691 = vset.pattern.permute.xlu2 %v1799_v52 }
  0x80   :  { %v149_v54 = vperm.slane %v141_v26, 3  ;;  %1690 = vset.pattern.permute.xlu1 %v1790_v16  ;;  %585 = vperm.xlu2 %1691, %v1871_v0  }
  0x81   :  { %v92_v42 = vadd.f32 %v84_v31, %v56_v37  ;;  %v93_v43 = vadd.f32 %v85_v32, %v57_v38  ;;  %v94_v44 = vadd.f32 %v86_v33, %v58_v39  ;;  %v95_v49 = vadd.f32 %v87_v34, %v59_v40  ;;  %561 = vperm.xlu1 %1690, %v1879_v4  }
  0x83   :  { %v128_v47 = vadd.f32 %v120_v41, %v92_v42  ;;  %v129_v55 = vadd.f32 %v121_v29, %v93_v43  ;;  %v130_v56 = vadd.f32 %v122_v30, %v94_v44  ;;  %v131_v57 = vadd.f32 %v123_v51, %v95_v49 }
  0x84   :  { %v1800_v42 = vmov 21  }
  0x85   :  { %v138_v58 = vpop.permute.xlu1 %137 }
  0x86   :  { %v156_v59 = vmul.f32 %v148_v53, %v138_v58  ;;  %v157_v60 = vmul.f32 %v149_v54, %v138_v58  ;;  %v158_v25 = vmul.f32 %v150_v45, %v138_v58  ;;  %v159_v48 = vmul.f32 %v151_v46, %v138_v58 }
  0x87   :  { %v134_v61 = vpop.permute.xlu0 %133 }
  0x88   :  { %v152_v62 = vmul.f32 %v148_v53, %v134_v61  ;;  %v153_v63 = vmul.f32 %v149_v54, %v134_v61  ;;  %v154_v1 = vmul.f32 %v150_v45, %v134_v61  ;;  %v155_v2 = vmul.f32 %v151_v46, %v134_v61  ;;  %v254_v12 = vpop.permute.xlu2 %253  ;;  %1693 = vset.pattern.permute.xlu2 %v1792_v18 }
  0x89   :  { %v164_v16 = vadd.f32 %v156_v59, %v128_v47  ;;  %v165_v3 = vadd.f32 %v157_v60, %v129_v55  ;;  %v166_v5 = vadd.f32 %v158_v25, %v130_v56  ;;  %v167_v6 = vadd.f32 %v159_v48, %v131_v57  ;;  %1692 = vset.pattern.permute.xlu1 %v1799_v52 }
  0x8a   :  { %v160_v7 = vadd.f32 %v152_v62, %v124_v17  ;;  %v161_v8 = vadd.f32 %v153_v63, %v125_v19  ;;  %v162_v9 = vadd.f32 %v154_v1, %v126_v20  ;;  %v163_v11 = vadd.f32 %v155_v2, %v127_v21  ;;  %613 = vperm.xlu2 %1693, %v1871_v0  }
  0x8b   :  { %589 = vperm.xlu1 %1692, %v1879_v4  }
  0x8c   :  { %v176_v13 = vadd.f32 %v1937_v35, %v160_v7  ;;  %v177_v14 = vadd.f32 %v1937_v35, %v161_v8  ;;  %v178_v15 = vadd.f32 %v1937_v35, %v162_v9  ;;  %v179_v22 = vadd.f32 %v1937_v35, %v163_v11 }
  0x8e   :  { %v184_v17 = vmul.f32 0.01, %v176_v13  ;;  %v185_v19 = vmul.f32 0.01, %v177_v14  ;;  %v186_v20 = vmul.f32 0.01, %v178_v15  ;;  %v174_v26 = vpop.permute.xlu1 %173 }
  0x8f   :  { %v187_v21 = vmul.f32 0.01, %v179_v22  ;;  %v1999_v28 = vadd.f32 %v174_v26, %v164_v16  ;;  %v2001_v35 = vadd.f32 %v174_v26, %v165_v3  ;;  %v2003_v31 = vadd.f32 %v174_v26, %v166_v5 }
  0x90   :  { %v1991_v23 = vmax.f32 %v176_v13, %v184_v17  ;;  %v1993_v18 = vmax.f32 %v177_v14, %v185_v19  ;;  %v1995_v24 = vmax.f32 %v178_v15, %v186_v20  ;;  %v2008_v36 = vadd.f32 %v174_v26, %v167_v6  ;;  %v206_v51 = vpop.permute.xlu0 %205 }
  0x91   :  { %v1997_v27 = vmax.f32 %v179_v22, %v187_v21  ;;  %v306_v29 = vpop.permute.xlu2 %305  ;;  %v1801_v22 = vmov 23   ;;  %v1802_v19 = vmov 22  }
  0x92   :  { %v256_v32 = vperm.slane %v1991_v23, 2  ;;  %v257_v33 = vperm.slane %v1993_v18, 2  ;;  %v258_v34 = vperm.slane %v1995_v24, 2  ;;  %v208_v41 = vperm.slane %v1991_v23, 0  ;;  %1696 = vset.pattern.permute.xlu2 %v1800_v42 }
  0x93   :  { %v259_v37 = vperm.slane %v1997_v27, 2  ;;  %1695 = vset.pattern.permute.xlu1 %v1800_v42  ;;  %v209_v43 = vperm.slane %v1993_v18, 0  ;;  %v210_v44 = vperm.slane %v1995_v24, 0  ;;  %v211_v49 = vperm.slane %v1997_v27, 0  ;;  %645 = vperm.xlu2 %1696, %v1879_v4  }
  0x94   :  { %v2013_v38 = vmul.f32 %v256_v32, %v254_v12  ;;  %v2017_v39 = vmul.f32 %v257_v33, %v254_v12  ;;  %v2021_v40 = vmul.f32 %v258_v34, %v254_v12  ;;  %641 = vperm.xlu1 %1695, %v1871_v0   ;;  %v228_v52 = vperm.slane %v1991_v23, 1 }
  0x95   :  { %v2026_v30 = vmul.f32 %v259_v37, %v254_v12  ;;  %v229_v53 = vperm.slane %v1993_v18, 1  ;;  %v230_v54 = vperm.slane %v1995_v24, 1  ;;  %v231_v45 = vperm.slane %v1997_v27, 1 }
  0x96   :  { %v216_v46 = vmul.f32 %v208_v41, %v206_v51  ;;  %v217_v47 = vmul.f32 %v209_v43, %v206_v51  ;;  %v218_v55 = vmul.f32 %v210_v44, %v206_v51  ;;  %v236_v56 = vmul.f32 %v228_v52, %v1977_v50 }
  0x97   :  { %v237_v57 = vmul.f32 %v229_v53, %v1977_v50  ;;  %v238_v58 = vmul.f32 %v230_v54, %v1977_v50  ;;  %v219_v4 = vmul.f32 %v211_v49, %v206_v51  ;;  %v222_v59 = vpop.permute.xlu1 %221  ;;  %v239_v60 = vmul.f32 %v231_v45, %v1977_v50 }
  0x98   :  { %v312_v25 = vperm.slane %v1991_v23, 4  ;;  %v313_v48 = vperm.slane %v1993_v18, 4  ;;  %v314_v61 = vperm.slane %v1995_v24, 4  ;;  %v2044_v62 = vadd.f32 %v236_v56, %v216_v46 }
  0x99   :  { %v2046_v63 = vadd.f32 %v237_v57, %v217_v47  ;;  %v2048_v1 = vadd.f32 %v238_v58, %v218_v55  ;;  %v315_v2 = vperm.slane %v1997_v27, 4  ;;  %v2051_v16 = vadd.f32 %v239_v60, %v219_v4 }
  0x9a   :  { %v2055_v3 = vmul.f32 %v312_v25, %v306_v29  ;;  %v2059_v50 = vmul.f32 %v313_v48, %v306_v29  ;;  %v2063_v5 = vmul.f32 %v314_v61, %v306_v29  ;;  %v212_v7 = vmul.f32 %v208_v41, %v1962_v10  ;;  %v334_v11 = vpop.permute.xlu2 %333  ;;  %v278_v41 = vpop.permute.xlu0 %277 }
  0x9b   :  { %v2067_v6 = vmul.f32 %v315_v2, %v306_v29  ;;  %v213_v8 = vmul.f32 %v209_v43, %v1962_v10  ;;  %v214_v9 = vmul.f32 %v210_v44, %v1962_v10  ;;  %v215_v12 = vmul.f32 %v211_v49, %v1962_v10  ;;  %1698 = vset.pattern.permute.xlu2 %v1801_v22 }
  0x9c   :  { %v232_v13 = vmul.f32 %v228_v52, %v222_v59  ;;  %v233_v14 = vmul.f32 %v229_v53, %v222_v59  ;;  %v234_v15 = vmul.f32 %v230_v54, %v222_v59  ;;  %v235_v17 = vmul.f32 %v231_v45, %v222_v59  ;;  %1697 = vset.pattern.permute.xlu1 %v1802_v19 }
  0x9d   :  { %685 = vperm.xlu2 %1698, %v1871_v0   ;;  %673 = vperm.xlu1 %1697, %v1871_v0   ;;  %v284_v42 = vperm.slane %v1991_v23, 3  ;;  %v285_v10 = vperm.slane %v1993_v18, 3  ;;  %v286_v43 = vperm.slane %v1995_v24, 3  ;;  %v287_v44 = vperm.slane %v1997_v27, 3 }
  0x9e   :  { %v240_v20 = vadd.f32 %v232_v13, %v212_v7  ;;  %v241_v21 = vadd.f32 %v233_v14, %v213_v8  ;;  %v242_v26 = vadd.f32 %v234_v15, %v214_v9  ;;  %v243_v29 = vadd.f32 %v235_v17, %v215_v12 }
  0x9f   :  { %v340_v49 = vperm.slane %v1991_v23, 5  ;;  %v341_v51 = vperm.slane %v1993_v18, 5  ;;  %v342_v52 = vperm.slane %v1995_v24, 5  ;;  %v288_v53 = vmul.f32 %v284_v42, %v278_v41 }
  0xa0   :  { %v289_v54 = vmul.f32 %v285_v10, %v278_v41  ;;  %v290_v45 = vmul.f32 %v286_v43, %v278_v41  ;;  %v343_v46 = vperm.slane %v1997_v27, 5  ;;  %v250_v47 = vpop.permute.xlu1 %249  ;;  %v291_v8 = vmul.f32 %v287_v44, %v278_v41 }
  0xa1   :  { %v2085_v55 = vmul.f32 %v340_v49, %v334_v11  ;;  %v2089_v56 = vmul.f32 %v341_v51, %v334_v11  ;;  %v2093_v57 = vmul.f32 %v342_v52, %v334_v11  ;;  %v260_v58 = vmul.f32 %v256_v32, %v250_v47 }
  0xa2   :  { %v2099_v4 = vmul.f32 %v343_v46, %v334_v11  ;;  %v261_v59 = vmul.f32 %v257_v33, %v250_v47  ;;  %v262_v60 = vmul.f32 %v258_v34, %v250_v47  ;;  %v263_v7 = vmul.f32 %v259_v37, %v250_v47 }
  0xa3   :  { %v268_v9 = vadd.f32 %v260_v58, %v240_v20  ;;  %v368_v12 = vperm.slane %v1991_v23, 6  ;;  %v369_v13 = vperm.slane %v1993_v18, 6  ;;  %v1803_v11 = vmov 26   ;;  %v366_v22 = vpop.permute.xlu2 %365 }
  0xa4   :  { %v269_v32 = vadd.f32 %v261_v59, %v241_v21  ;;  %v270_v14 = vadd.f32 %v262_v60, %v242_v26  ;;  %v271_v15 = vadd.f32 %v263_v7, %v243_v29  ;;  %v370_v33 = vperm.slane %v1995_v24, 6 }
  0xa5   :  { %1701 = vset.pattern.permute.xlu2 %v1803_v11  ;;  %v296_v17 = vadd.f32 %v288_v53, %v268_v9  ;;  %v1804_v19 = vmov 25   ;;  %v371_v34 = vperm.slane %v1997_v27, 6  ;;  %v2114_v37 = vmul.f32 %v368_v12, %v366_v22 }
  0xa6   :  { %1700 = vset.pattern.permute.xlu1 %v1804_v19  ;;  %733 = vperm.xlu2 %1701, %v1871_v0   ;;  %v2118_v20 = vmul.f32 %v369_v13, %v366_v22  ;;  %v297_v21 = vadd.f32 %v289_v54, %v269_v32  ;;  %v298_v26 = vadd.f32 %v290_v45, %v270_v14  ;;  %v396_v32 = vperm.slane %v1991_v23, 7 }
  0xa7   :  { %v299_v41 = vadd.f32 %v291_v8, %v271_v15  ;;  %v2122_v29 = vmul.f32 %v370_v33, %v366_v22  ;;  %717 = vperm.xlu1 %1700, %v1871_v0   ;;  %v2127_v53 = vmul.f32 %v371_v34, %v366_v22  ;;  %v272_v47 = vadd.f32 %v2013_v38, %v2044_v62 }
  0xa8   :  { %v273_v58 = vadd.f32 %v2017_v39, %v2046_v63  ;;  %v274_v54 = vadd.f32 %v2021_v40, %v2048_v1  ;;  %v275_v45 = vadd.f32 %v2026_v30, %v2051_v16  ;;  %v397_v14 = vperm.slane %v1993_v18, 7 }
  0xa9   :  { %v282_v59 = vpop.permute.xlu1 %281  ;;  %v398_v38 = vperm.slane %v1995_v24, 7  ;;  %v1805_v11 = vmov 28   ;;  %v399_v30 = vperm.slane %v1997_v27, 7  ;;  %v191_v1 = vmul.f32 0.01, %v2008_v36 }
  0xaa   :  { %v292_v60 = vmul.f32 %v284_v42, %v282_v59  ;;  %v293_v7 = vmul.f32 %v285_v10, %v282_v59  ;;  %v294_v8 = vmul.f32 %v286_v43, %v282_v59  ;;  %v295_v9 = vmul.f32 %v287_v44, %v282_v59 }
  0xab   :  { %v1806_v16 = vmov 27   ;;  %v324_v22 = vadd.f32 %v2055_v3, %v296_v17  ;;  %v325_v19 = vadd.f32 %v2059_v50, %v297_v21  ;;  %v1813_v27 = vmov 35  }
  0xac   :  { %v300_v62 = vadd.f32 %v292_v60, %v272_v47  ;;  %v301_v15 = vadd.f32 %v293_v7, %v273_v58  ;;  %v302_v39 = vadd.f32 %v294_v8, %v274_v54  ;;  %v303_v63 = vadd.f32 %v295_v9, %v275_v45  ;;  %v394_v40 = vpop.permute.xlu2 %393  ;;  %v338_v45 = vpop.permute.xlu0 %337 }
  0xad   :  { %v2145_v42 = vmul.f32 %v396_v32, %v394_v40  ;;  %v2149_v10 = vmul.f32 %v397_v14, %v394_v40  ;;  %v2153_v43 = vmul.f32 %v398_v38, %v394_v40  ;;  %v2157_v44 = vmul.f32 %v399_v30, %v394_v40 }
  0xae   :  { %1703 = vset.pattern.permute.xlu2 %v1805_v11  ;;  %v326_v47 = vadd.f32 %v2063_v5, %v298_v26  ;;  %v327_v58 = vadd.f32 %v2067_v6, %v299_v41  ;;  %v2165_v54 = vmax.f32 %v2008_v36, %v191_v1  ;;  %v352_v59 = vadd.f32 %v2085_v55, %v324_v22 }
  0xaf   :  { %1702 = vset.pattern.permute.xlu1 %v1806_v16  ;;  %765 = vperm.xlu2 %1703, %v1871_v0   ;;  %v353_v7 = vadd.f32 %v2089_v56, %v325_v19  ;;  %v348_v6 = vmul.f32 %v340_v49, %v338_v45  ;;  %v349_v55 = vmul.f32 %v341_v51, %v338_v45 }
  0xb0   :  { %749 = vperm.xlu1 %1702, %v1871_v0   ;;  %v354_v8 = vadd.f32 %v2093_v57, %v326_v47  ;;  %v355_v9 = vadd.f32 %v2099_v4, %v327_v58  ;;  %v350_v56 = vmul.f32 %v342_v52, %v338_v45  ;;  %v455_v49 = vperm.slane %v2165_v54, 1 }
  0xb1   :  { %v511_v18 = vperm.slane %v2165_v54, 3 }
  0xb2   :  { %v310_v60 = vpop.permute.xlu1 %309 }
  0xb3   :  { %v320_v3 = vmul.f32 %v312_v25, %v310_v60  ;;  %v321_v50 = vmul.f32 %v313_v48, %v310_v60  ;;  %v322_v36 = vmul.f32 %v314_v61, %v310_v60  ;;  %v323_v5 = vmul.f32 %v315_v2, %v310_v60 }
  0xb4   :  { %v351_v25 = vmul.f32 %v343_v46, %v338_v45  ;;  %v1807_v61 = vmov 31   ;;  %v1808_v2 = vmov 30  }
  0xb5   :  { %v328_v57 = vadd.f32 %v320_v3, %v300_v62  ;;  %v329_v48 = vadd.f32 %v321_v50, %v301_v15  ;;  %v330_v4 = vadd.f32 %v322_v36, %v302_v39  ;;  %v331_v17 = vadd.f32 %v323_v5, %v303_v63  ;;  %v2187_v21 = vpop.permute.xlu2 %445 }
  0xb6   :  { %v2195_v46 = vmul.f32 %v455_v49, %v2187_v21  ;;  %v188_v62 = vmul.f32 0.01, %v1999_v28  ;;  %v189_v15 = vmul.f32 0.01, %v2001_v35  ;;  %v190_v39 = vmul.f32 0.01, %v2003_v31 }
  0xb7   :  { %1706 = vset.pattern.permute.xlu2 %v1807_v61  ;;  %v356_v51 = vadd.f32 %v348_v6, %v328_v57  ;;  %v357_v26 = vadd.f32 %v349_v55, %v329_v48  ;;  %v358_v52 = vadd.f32 %v350_v56, %v330_v4  ;;  %v359_v41 = vadd.f32 %v351_v25, %v331_v17 }
  0xb8   :  { %1705 = vset.pattern.permute.xlu1 %v1808_v2  ;;  %813 = vperm.xlu2 %1706, %v1871_v0   ;;  %v427_v50 = vperm.slane %v2165_v54, 0  ;;  %v1811_v6 = vmov 39   ;;  %v483_v25 = vperm.slane %v2165_v54, 2 }
  0xb9   :  { %797 = vperm.xlu1 %1705, %v1871_v0   ;;  %v384_v63 = vadd.f32 %v2114_v37, %v356_v51  ;;  %v385_v40 = vadd.f32 %v2118_v20, %v357_v26  ;;  %v386_v1 = vadd.f32 %v2122_v29, %v358_v52  ;;  %v387_v16 = vadd.f32 %v2127_v53, %v359_v41 }
  0xba   :  { %v2213_v37 = vmax.f32 %v1999_v28, %v188_v62  ;;  %v2216_v20 = vmax.f32 %v2001_v35, %v189_v15  ;;  %v2219_v29 = vmax.f32 %v2003_v31, %v190_v39  ;;  %1714 = vset.pattern.permute.xlu0 %v1811_v6  ;;  %v1812_v52 = vmov 36  }
  0xbb   :  { %v362_v11 = vpop.permute.xlu1 %361  ;;  %v2224_v28 = vadd.f32 %v2145_v42, %v384_v63  ;;  %v2227_v35 = vadd.f32 %v2149_v10, %v385_v40  ;;  %v2230_v31 = vadd.f32 %v2153_v43, %v386_v1  ;;  %941 = vperm.xlu0 %1714, %v1871_v0  }
  0xbc   :  { %v372_v22 = vmul.f32 %v368_v12, %v362_v11  ;;  %v373_v19 = vmul.f32 %v369_v13, %v362_v11  ;;  %v374_v47 = vmul.f32 %v370_v33, %v362_v11  ;;  %v375_v58 = vmul.f32 %v371_v34, %v362_v11  ;;  %v418_v34 = vpop.permute.xlu0 %417 }
  0xbd   :  { %v1809_v13 = vmov 33   ;;  %v1810_v33 = vmov 32   ;;  %v431_v10 = vmul.f32 %v427_v50, %v418_v34  ;;  %v480_v43 = vperm.slane %v2213_v37, 2 }
  0xbe   :  { %v380_v53 = vadd.f32 %v372_v22, %v352_v59  ;;  %v381_v12 = vadd.f32 %v373_v19, %v353_v7  ;;  %v382_v45 = vadd.f32 %v374_v47, %v354_v8  ;;  %v383_v60 = vadd.f32 %v375_v58, %v355_v9  ;;  %v474_v3 = vpop.permute.xlu2 %473 }
  0xbf   :  { %v424_v59 = vperm.slane %v2213_v37, 0  ;;  %v425_v7 = vperm.slane %v2216_v20, 0  ;;  %v426_v8 = vperm.slane %v2219_v29, 0  ;;  %v2236_v9 = vadd.f32 %v2157_v44, %v387_v16 }
  0xc0   :  { %1708 = vset.pattern.permute.xlu2 %v1809_v13  ;;  %v481_v55 = vperm.slane %v2216_v20, 2  ;;  %v482_v56 = vperm.slane %v2219_v29, 2  ;;  %v452_v44 = vperm.slane %v2213_v37, 1  ;;  %v453_v2 = vperm.slane %v2216_v20, 1 }
  0xc1   :  { %1707 = vset.pattern.permute.xlu1 %v1810_v33  ;;  %845 = vperm.xlu2 %1708, %v1871_v0   ;;  %v428_v36 = vmul.f32 %v424_v59, %v418_v34  ;;  %v429_v42 = vmul.f32 %v425_v7, %v418_v34  ;;  %v430_v5 = vmul.f32 %v426_v8, %v418_v34  ;;  %v454_v51 = vperm.slane %v2219_v29, 1 }
  0xc2   :  { %829 = vperm.xlu1 %1707, %v1871_v0   ;;  %v456_v26 = vmul.f32 %v452_v44, %v2187_v21  ;;  %v484_v40 = vmul.f32 %v480_v43, %v474_v3  ;;  %v485_v1 = vmul.f32 %v481_v55, %v474_v3  ;;  %v487_v16 = vmul.f32 %v483_v25, %v474_v3 }
  0xc3   :  { %v458_v41 = vmul.f32 %v454_v51, %v2187_v21  ;;  %v1814_v22 = vmov 44  }
  0xc4   :  { %v390_v57 = vpop.permute.xlu1 %389  ;;  %1719 = vset.pattern.permute.xlu0 %v1814_v22 }
  0xc5   :  { %v400_v48 = vmul.f32 %v396_v32, %v390_v57  ;;  %v401_v4 = vmul.f32 %v397_v14, %v390_v57  ;;  %v402_v17 = vmul.f32 %v398_v38, %v390_v57  ;;  %v403_v61 = vmul.f32 %v399_v30, %v390_v57  ;;  %1017 = vperm.xlu0 %1719, %v1871_v0  }
  0xc6   :  { %v457_v30 = vmul.f32 %v453_v2, %v2187_v21  ;;  %v486_v21 = vmul.f32 %v482_v56, %v474_v3  ;;  %v1816_v57 = vmov 37  }
  0xc7   :  { %v2258_v23 = vpop.permute.xlu2 %505  ;;  %v408_v32 = vadd.f32 %v400_v48, %v380_v53  ;;  %v409_v24 = vadd.f32 %v401_v4, %v381_v12  ;;  %v410_v14 = vadd.f32 %v402_v17, %v382_v45  ;;  %v411_v38 = vadd.f32 %v403_v61, %v383_v60  ;;  %v478_v48 = vpop.permute.xlu0 %477 }
  0xc8   :  { %v2271_v62 = vmul.f32 %v511_v18, %v2258_v23  ;;  %v510_v4 = vperm.slane %v2219_v29, 3 }
  0xc9   :  { %1711 = vset.pattern.permute.xlu2 %v1812_v52  ;;  %v436_v15 = vadd.f32 %v428_v36, %v408_v32  ;;  %v437_v39 = vadd.f32 %v429_v42, %v409_v24  ;;  %v438_v63 = vadd.f32 %v430_v5, %v410_v14  ;;  %v439_v11 = vadd.f32 %v431_v10, %v411_v38 }
  0xca   :  { %1710 = vset.pattern.permute.xlu1 %v1813_v27  ;;  %893 = vperm.xlu2 %1711, %v1871_v0   ;;  %v1815_v10 = vmov 38   ;;  %v537_v52 = vperm.slane %v2216_v20, 4  ;;  %v538_v32 = vperm.slane %v2219_v29, 4 }
  0xcb   :  { %877 = vperm.xlu1 %1710, %v1871_v0   ;;  %v464_v19 = vadd.f32 %v456_v26, %v436_v15  ;;  %v465_v47 = vadd.f32 %v457_v30, %v437_v39  ;;  %v466_v58 = vadd.f32 %v458_v41, %v438_v63  ;;  %v467_v53 = vadd.f32 %v2195_v46, %v439_v11 }
  0xcc   :  { %v536_v26 = vperm.slane %v2213_v37, 4  ;;  %v518_v30 = vmul.f32 %v510_v4, %v2258_v23  ;;  %v1818_v41 = vmov 40  }
  0xcd   :  { %v422_v12 = vpop.permute.xlu1 %421  ;;  %v2284_v45 = vadd.f32 %v484_v40, %v464_v19  ;;  %v2286_v60 = vadd.f32 %v485_v1, %v465_v47  ;;  %v2288_v13 = vadd.f32 %v486_v21, %v466_v58  ;;  %v2290_v33 = vadd.f32 %v487_v16, %v467_v53 }
  0xce   :  { %v432_v34 = vmul.f32 %v424_v59, %v422_v12  ;;  %v433_v3 = vmul.f32 %v425_v7, %v422_v12  ;;  %v434_v36 = vmul.f32 %v426_v8, %v422_v12  ;;  %v435_v42 = vmul.f32 %v427_v50, %v422_v12  ;;  %v2299_v59 = vld [vmem:[%s2713_s3] sm:$0xff]  ;;  %s1833_s3 = smov 112  }
  0xcf   :  { %v491_v7 = vmul.f32 %v483_v25, %v478_v48  ;;  %v1817_v8 = vmov 49   ;;  %v509_v50 = vperm.slane %v2216_v20, 3  ;;  %v1819_v21 = vmov 41  }
  0xd0   :  { %v440_v5 = vadd.f32 %v432_v34, %v2224_v28  ;;  %v441_v6 = vadd.f32 %v433_v3, %v2227_v35  ;;  %v442_v46 = vadd.f32 %v434_v36, %v2230_v31  ;;  %v443_v0 = vadd.f32 %v435_v42, %v2236_v9  ;;  %1724 = vset.pattern.permute.xlu0 %v1817_v8 }
  0xd1   :  { %v488_v28 = vmul.f32 %v480_v43, %v478_v48  ;;  %v489_v35 = vmul.f32 %v481_v55, %v478_v48  ;;  %v490_v31 = vmul.f32 %v482_v56, %v478_v48  ;;  %v508_v9 = vperm.slane %v2213_v37, 3  ;;  %1089 = vperm.xlu0 %1724, %v2299_v59   ;;  %v534_v43 = vpop.permute.xlu2 %533 }
  0xd2   :  { %1713 = vset.pattern.permute.xlu2 %v1815_v10  ;;  %v544_v11 = vmul.f32 %v536_v26, %v534_v43  ;;  %v545_v40 = vmul.f32 %v537_v52, %v534_v43  ;;  %v546_v1 = vmul.f32 %v538_v32, %v534_v43  ;;  %v1820_v48 = vmov 42  }
  0xd3   :  { %1712 = vset.pattern.permute.xlu1 %v1816_v57  ;;  %925 = vperm.xlu2 %1713, %v2299_v59  }
  0xd4   :  { %909 = vperm.xlu1 %1712, %v2299_v59  }
  0xd6   :  { %v450_v17 = vpop.permute.xlu1 %449 }
  0xd7   :  { %v460_v55 = vmul.f32 %v452_v44, %v450_v17  ;;  %v461_v56 = vmul.f32 %v453_v2, %v450_v17  ;;  %v462_v25 = vmul.f32 %v454_v51, %v450_v17  ;;  %v463_v61 = vmul.f32 %v455_v49, %v450_v17 }
  0xd8   :  { %v516_v44 = vmul.f32 %v508_v9, %v2258_v23  ;;  %v517_v2 = vmul.f32 %v509_v50, %v2258_v23  ;;  %v539_v51 = vperm.slane %v2165_v54, 4 }
  0xd9   :  { %v468_v24 = vadd.f32 %v460_v55, %v440_v5  ;;  %v469_v14 = vadd.f32 %v461_v56, %v441_v6  ;;  %v470_v38 = vadd.f32 %v462_v25, %v442_v46  ;;  %v471_v27 = vadd.f32 %v463_v61, %v443_v0 }
  0xda   :  { %v547_v23 = vmul.f32 %v539_v51, %v534_v43  ;;  %v586_v46 = vpop.permute.xlu2 %585  ;;  %v592_v55 = vperm.slane %v2213_v37, 6 }
  0xdb   :  { %v496_v49 = vadd.f32 %v488_v28, %v468_v24  ;;  %v497_v15 = vadd.f32 %v489_v35, %v469_v14  ;;  %v498_v39 = vadd.f32 %v490_v31, %v470_v38  ;;  %v499_v63 = vadd.f32 %v491_v7, %v471_v27  ;;  %1716 = vset.pattern.permute.xlu2 %v1819_v21  ;;  %v558_v28 = vpop.permute.xlu0 %557 }
  0xdc   :  { %1715 = vset.pattern.permute.xlu1 %v1818_v41  ;;  %969 = vperm.xlu2 %1716, %v2299_v59   ;;  %v564_v35 = vperm.slane %v2213_v37, 5  ;;  %v565_v31 = vperm.slane %v2216_v20, 5  ;;  %v1821_v7 = vmov 43   ;;  %v593_v38 = vperm.slane %v2216_v20, 6 }
  0xdd   :  { %953 = vperm.xlu1 %1715, %v2299_v59   ;;  %v524_v16 = vadd.f32 %v516_v44, %v496_v49  ;;  %v525_v22 = vadd.f32 %v517_v2, %v497_v15  ;;  %v526_v19 = vadd.f32 %v518_v30, %v498_v39  ;;  %v527_v47 = vadd.f32 %v2271_v62, %v499_v63 }
  0xde   :  { %v569_v8 = vmul.f32 %v565_v31, %v558_v28  ;;  %v594_v27 = vperm.slane %v2219_v29, 6  ;;  %v595_v44 = vperm.slane %v2165_v54, 6  ;;  %v596_v39 = vmul.f32 %v592_v55, %v586_v46 }
  0xdf   :  { %v502_v58 = vpop.permute.xlu1 %501  ;;  %v2339_v53 = vadd.f32 %v544_v11, %v524_v16  ;;  %v2341_v12 = vadd.f32 %v545_v40, %v525_v22  ;;  %v2343_v34 = vadd.f32 %v546_v1, %v526_v19  ;;  %v2345_v3 = vadd.f32 %v547_v23, %v527_v47 }
  0xe0   :  { %v512_v36 = vmul.f32 %v508_v9, %v502_v58  ;;  %v513_v42 = vmul.f32 %v509_v50, %v502_v58  ;;  %v514_v5 = vmul.f32 %v510_v4, %v502_v58  ;;  %v515_v6 = vmul.f32 %v511_v18, %v502_v58 }
  0xe1   :  { %v566_v18 = vperm.slane %v2219_v29, 5  ;;  %v622_v9 = vperm.slane %v2219_v29, 7  ;;  %v623_v50 = vperm.slane %v2165_v54, 7  ;;  %v1822_v4 = vmov 54  }
  0xe2   :  { %v520_v0 = vadd.f32 %v512_v36, %v2284_v45  ;;  %v521_v62 = vadd.f32 %v513_v42, %v2286_v60  ;;  %v522_v10 = vadd.f32 %v514_v5, %v2288_v13  ;;  %v523_v57 = vadd.f32 %v515_v6, %v2290_v33  ;;  %1729 = vset.pattern.permute.xlu0 %v1822_v4 }
  0xe3   :  { %v567_v45 = vperm.slane %v2165_v54, 5  ;;  %v620_v60 = vperm.slane %v2213_v37, 7  ;;  %v621_v13 = vperm.slane %v2216_v20, 7  ;;  %v568_v33 = vmul.f32 %v564_v35, %v558_v28  ;;  %1193 = vperm.xlu0 %1729, %v2299_v59  }
  0xe4   :  { %1718 = vset.pattern.permute.xlu2 %v1821_v7  ;;  %v570_v17 = vmul.f32 %v566_v18, %v558_v28  ;;  %v614_v2 = vpop.permute.xlu2 %613  ;;  %v598_v63 = vmul.f32 %v594_v27, %v586_v46  ;;  %v599_v11 = vmul.f32 %v595_v44, %v586_v46  ;;  %v1824_v19 = vmov 46  }
  0xe5   :  { %1717 = vset.pattern.permute.xlu1 %v1820_v48  ;;  %1001 = vperm.xlu2 %1718, %v2299_v59   ;;  %v571_v43 = vmul.f32 %v567_v45, %v558_v28  ;;  %v624_v23 = vmul.f32 %v620_v60, %v614_v2  ;;  %v625_v21 = vmul.f32 %v621_v13, %v614_v2  ;;  %v1827_v37 = vmov 50  }
  0xe6   :  { %985 = vperm.xlu1 %1717, %v2299_v59   ;;  %v626_v16 = vmul.f32 %v622_v9, %v614_v2  ;;  %v627_v22 = vmul.f32 %v623_v50, %v614_v2  ;;  %v1828_v20 = vmov 51  }
  0xe9   :  { %v530_v56 = vpop.permute.xlu1 %529 }
  0xea   :  { %v540_v25 = vmul.f32 %v536_v26, %v530_v56  ;;  %v541_v61 = vmul.f32 %v537_v52, %v530_v56  ;;  %v542_v24 = vmul.f32 %v538_v32, %v530_v56  ;;  %v543_v14 = vmul.f32 %v539_v51, %v530_v56  ;;  %v618_v56 = vpop.permute.xlu0 %617 }
  0xeb   :  { %v597_v26 = vmul.f32 %v593_v38, %v586_v46  ;;  %v1823_v52 = vmov 45  }
  0xec   :  { %v548_v30 = vadd.f32 %v540_v25, %v520_v0  ;;  %v549_v41 = vadd.f32 %v541_v61, %v521_v62  ;;  %v550_v49 = vadd.f32 %v542_v24, %v522_v10  ;;  %v551_v15 = vadd.f32 %v543_v14, %v523_v57 }
  0xed   :  { %1721 = vset.pattern.permute.xlu2 %v1824_v19  ;;  %v1826_v25 = vmov 48   ;;  %v631_v61 = vmul.f32 %v623_v50, %v618_v56 }
  0xee   :  { %1720 = vset.pattern.permute.xlu1 %v1823_v52  ;;  %v576_v40 = vadd.f32 %v568_v33, %v548_v30  ;;  %v577_v32 = vadd.f32 %v569_v8, %v549_v41  ;;  %v578_v51 = vadd.f32 %v570_v17, %v550_v49  ;;  %v579_v1 = vadd.f32 %v571_v43, %v551_v15  ;;  %v2388_v17 = vpop.permute.xlu2 %645 }
  0xef   :  { %1033 = vperm.xlu1 %1720, %v2299_v59   ;;  %1049 = vperm.xlu2 %1721, %v2299_v59   ;;  %v1825_v43 = vmov 47  }
  0xf0   :  { %v604_v47 = vadd.f32 %v596_v39, %v576_v40  ;;  %v605_v58 = vadd.f32 %v597_v26, %v577_v32  ;;  %v606_v36 = vadd.f32 %v598_v63, %v578_v51  ;;  %v607_v42 = vadd.f32 %v599_v11, %v579_v1 }
  0xf1   :  { %v1829_v26 = vmov 52   ;;  %v1830_v51 = vmov 53  }
  0xf2   :  { %v632_v6 = vadd.f32 %v624_v23, %v604_v47  ;;  %v633_v46 = vadd.f32 %v625_v21, %v605_v58  ;;  %v634_v0 = vadd.f32 %v626_v16, %v606_v36  ;;  %v635_v62 = vadd.f32 %v627_v22, %v607_v42 }
  0xf3   :  { %v562_v5 = vpop.permute.xlu1 %561 }
  0xf4   :  { %v572_v10 = vmul.f32 %v564_v35, %v562_v5  ;;  %v573_v57 = vmul.f32 %v565_v31, %v562_v5  ;;  %v574_v48 = vmul.f32 %v566_v18, %v562_v5  ;;  %v575_v28 = vmul.f32 %v567_v45, %v562_v5 }
  0xf5   :  { %v630_v45 = vmul.f32 %v622_v9, %v618_v56 }
  0xf6   :  { %v580_v7 = vadd.f32 %v572_v10, %v2339_v53  ;;  %v581_v33 = vadd.f32 %v573_v57, %v2341_v12  ;;  %v582_v8 = vadd.f32 %v574_v48, %v2343_v34  ;;  %v583_v4 = vadd.f32 %v575_v28, %v2345_v3 }
  0xf7   :  { %1722 = vset.pattern.permute.xlu1 %v1825_v43  ;;  %1723 = vset.pattern.permute.xlu2 %v1826_v25  ;;  %v628_v53 = vmul.f32 %v620_v60, %v618_v56  ;;  %v629_v3 = vmul.f32 %v621_v13, %v618_v56  ;;  %v686_v60 = vpop.permute.xlu2 %685 }
  0xf8   :  { %1065 = vperm.xlu1 %1722, %v2299_v59   ;;  %1081 = vperm.xlu2 %1723, %v2299_v59  }
  0xfd   :  { %v590_v35 = vpop.permute.xlu1 %589 }
  0xfe   :  { %v600_v12 = vmul.f32 %v592_v55, %v590_v35  ;;  %v601_v31 = vmul.f32 %v593_v38, %v590_v35  ;;  %v602_v34 = vmul.f32 %v594_v27, %v590_v35  ;;  %v603_v18 = vmul.f32 %v595_v44, %v590_v35 }
 0x100   :  { %v608_v24 = vadd.f32 %v600_v12, %v580_v7  ;;  %v609_v14 = vadd.f32 %v601_v31, %v581_v33  ;;  %v610_v2 = vadd.f32 %v602_v34, %v582_v8  ;;  %v611_v30 = vadd.f32 %v603_v18, %v583_v4  ;;  %1725 = vset.pattern.permute.xlu1 %v1827_v37  ;;  %v2409_v40 = vpop.permute.xlu2 %733 }
 0x101   :  { %1113 = vperm.xlu1 %1725, %v2299_v59   ;;  %1726 = vset.pattern.permute.xlu2 %v1828_v20  ;;  %v1831_v7 = vmov 55  }
 0x102   :  { %v636_v55 = vadd.f32 %v628_v53, %v608_v24  ;;  %v637_v38 = vadd.f32 %v629_v3, %v609_v14  ;;  %v638_v27 = vadd.f32 %v630_v45, %v610_v2  ;;  %v639_v44 = vadd.f32 %v631_v61, %v611_v30  ;;  %1133 = vperm.xlu2 %1726, %v2299_v59   ;;  %v702_v3 = vpop.permute.xlu0 %701 }
 0x104   :  { %v652_v1 = vadd.f32 %v2388_v17, %v636_v55  ;;  %v653_v23 = vadd.f32 %v2388_v17, %v637_v38  ;;  %v654_v5 = vadd.f32 %v2388_v17, %v638_v27 }
 0x106   :  { %v642_v29 = vpop.permute.xlu1 %641  ;;  %v662_v56 = vmul.f32 0.01, %v654_v5 }
 0x107   :  { %v648_v54 = vadd.f32 %v642_v29, %v632_v6  ;;  %v649_v13 = vadd.f32 %v642_v29, %v633_v46  ;;  %v650_v9 = vadd.f32 %v642_v29, %v634_v0  ;;  %v651_v50 = vadd.f32 %v642_v29, %v635_v62 }
 0x108   :  { %v655_v6 = vadd.f32 %v2388_v17, %v639_v44  ;;  %v660_v46 = vmul.f32 0.01, %v652_v1  ;;  %v661_v0 = vmul.f32 0.01, %v653_v23 }
 0x109   :  { %v656_v41 = vmul.f32 0.01, %v648_v54  ;;  %v657_v49 = vmul.f32 0.01, %v649_v13  ;;  %v658_v15 = vmul.f32 0.01, %v650_v9  ;;  %1727 = vset.pattern.permute.xlu1 %v1829_v26  ;;  %v2431_v35 = vpop.permute.xlu2 %765 }
 0x10a   :  { %v659_v39 = vmul.f32 0.01, %v651_v50  ;;  %1153 = vperm.xlu1 %1727, %v2299_v59   ;;  %1728 = vset.pattern.permute.xlu2 %v1830_v51  ;;  %v663_v25 = vmul.f32 0.01, %v655_v6  ;;  %v2427_v53 = vmax.f32 %v652_v1, %v660_v46  ;;  %v2429_v17 = vmax.f32 %v653_v23, %v661_v0 }
 0x10b   :  { %v2402_v63 = vmax.f32 %v648_v54, %v656_v41  ;;  %v2404_v11 = vmax.f32 %v649_v13, %v657_v49  ;;  %v2406_v52 = vmax.f32 %v650_v9, %v658_v15  ;;  %1173 = vperm.xlu2 %1728, %v2299_v59  }
 0x10c   :  { %v2411_v32 = vmax.f32 %v651_v50, %v659_v39  ;;  %v2443_v39 = vmax.f32 %v654_v5, %v662_v56  ;;  %v2445_v26 = vmax.f32 %v655_v6, %v663_v25 }
 0x10d   :  { %v676_v21 = vperm.slane %v2402_v63, 0  ;;  %v677_v16 = vperm.slane %v2404_v11, 0  ;;  %v678_v22 = vperm.slane %v2406_v52, 0  ;;  %v688_v58 = vperm.slane %v2402_v63, 1 }
 0x10e   :  { %v679_v47 = vperm.slane %v2411_v32, 0  ;;  %v689_v36 = vperm.slane %v2404_v11, 1  ;;  %v690_v42 = vperm.slane %v2406_v52, 1  ;;  %v691_v10 = vperm.slane %v2411_v32, 1 }
 0x10f   :  { %v674_v19 = vpop.permute.xlu1 %673  ;;  %v692_v57 = vmul.f32 %v688_v58, %v686_v60  ;;  %v704_v31 = vperm.slane %v2402_v63, 2  ;;  %v705_v34 = vperm.slane %v2404_v11, 2  ;;  %v706_v18 = vperm.slane %v2406_v52, 2 }
 0x110   :  { %v680_v62 = vmul.f32 %v676_v21, %v674_v19  ;;  %v681_v48 = vmul.f32 %v677_v16, %v674_v19  ;;  %v693_v28 = vmul.f32 %v689_v36, %v686_v60  ;;  %v682_v33 = vmul.f32 %v678_v22, %v674_v19 }
 0x111   :  { %v683_v8 = vmul.f32 %v679_v47, %v674_v19  ;;  %v694_v4 = vmul.f32 %v690_v42, %v686_v60  ;;  %v695_v43 = vmul.f32 %v691_v10, %v686_v60  ;;  %v768_v45 = vperm.slane %v2402_v63, 6 }
 0x112   :  { %1730 = vset.pattern.permute.xlu1 %v1831_v7  ;;  %v696_v12 = vadd.f32 %v692_v57, %v680_v62  ;;  %v769_v61 = vperm.slane %v2404_v11, 6  ;;  %v697_v24 = vadd.f32 %v693_v28, %v681_v48  ;;  %v707_v14 = vperm.slane %v2411_v32, 2  ;;  %v814_v62 = vpop.permute.xlu2 %813 }
 0x113   :  { %1213 = vperm.xlu1 %1730, %v2299_v59   ;;  %v698_v2 = vadd.f32 %v694_v4, %v682_v33  ;;  %v699_v30 = vadd.f32 %v695_v43, %v683_v8  ;;  %v708_v37 = vmul.f32 %v704_v31, %v702_v3  ;;  %v720_v60 = vperm.slane %v2402_v63, 3 }
 0x114   :  { %v709_v38 = vmul.f32 %v705_v34, %v702_v3  ;;  %v721_v27 = vperm.slane %v2404_v11, 3  ;;  %v722_v44 = vperm.slane %v2406_v52, 3  ;;  %v723_v20 = vperm.slane %v2411_v32, 3 }
 0x115   :  { %v710_v29 = vmul.f32 %v706_v18, %v702_v3  ;;  %v711_v54 = vmul.f32 %v707_v14, %v702_v3  ;;  %v712_v13 = vadd.f32 %v708_v37, %v696_v12  ;;  %v770_v51 = vperm.slane %v2406_v52, 6 }
 0x116   :  { %v713_v50 = vadd.f32 %v709_v38, %v697_v24  ;;  %v771_v23 = vperm.slane %v2411_v32, 6  ;;  %v736_v47 = vperm.slane %v2402_v63, 4  ;;  %v737_v58 = vperm.slane %v2404_v11, 4 }
 0x117   :  { %v714_v1 = vadd.f32 %v710_v29, %v698_v2  ;;  %v715_v21 = vadd.f32 %v711_v54, %v699_v30  ;;  %v738_v36 = vperm.slane %v2406_v52, 4  ;;  %v772_v42 = vmul.f32 %v768_v45, %v2431_v35 }
 0x118   :  { %v773_v5 = vmul.f32 %v769_v61, %v2431_v35  ;;  %v739_v46 = vperm.slane %v2411_v32, 4  ;;  %v774_v0 = vmul.f32 %v770_v51, %v2431_v35  ;;  %v740_v10 = vmul.f32 %v736_v47, %v2409_v40 }
 0x119   :  { %v718_v55 = vpop.permute.xlu1 %717  ;;  %v741_v57 = vmul.f32 %v737_v58, %v2409_v40  ;;  %v742_v48 = vmul.f32 %v738_v36, %v2409_v40  ;;  %v752_v7 = vperm.slane %v2402_v63, 5  ;;  %v753_v33 = vperm.slane %v2404_v11, 5 }
 0x11a   :  { %v724_v9 = vmul.f32 %v720_v60, %v718_v55  ;;  %v725_v41 = vmul.f32 %v721_v27, %v718_v55  ;;  %v726_v49 = vmul.f32 %v722_v44, %v718_v55  ;;  %v727_v15 = vmul.f32 %v723_v20, %v718_v55  ;;  %v782_v44 = vpop.permute.xlu0 %781 }
 0x11b   :  { %v743_v28 = vmul.f32 %v739_v46, %v2409_v40  ;;  %v754_v8 = vperm.slane %v2406_v52, 5  ;;  %v755_v12 = vperm.slane %v2411_v32, 5  ;;  %v784_v61 = vperm.slane %v2402_v63, 7 }
 0x11c   :  { %v728_v16 = vadd.f32 %v724_v9, %v712_v13  ;;  %v729_v22 = vadd.f32 %v725_v41, %v713_v50  ;;  %v730_v19 = vadd.f32 %v726_v49, %v714_v1  ;;  %v731_v6 = vadd.f32 %v727_v15, %v715_v21  ;;  %v846_v49 = vpop.permute.xlu2 %845 }
 0x11d   :  { %v785_v40 = vperm.slane %v2404_v11, 7  ;;  %v786_v24 = vperm.slane %v2406_v52, 7  ;;  %v787_v37 = vperm.slane %v2411_v32, 7  ;;  %v775_v60 = vmul.f32 %v771_v23, %v2431_v35 }
 0x11e   :  { %v744_v43 = vadd.f32 %v740_v10, %v728_v16  ;;  %v745_v56 = vadd.f32 %v741_v57, %v729_v22  ;;  %v746_v25 = vadd.f32 %v742_v48, %v730_v19  ;;  %v747_v31 = vadd.f32 %v743_v28, %v731_v6 }
 0x11f   :  { %v816_v55 = vperm.slane %v2427_v53, 1  ;;  %v817_v38 = vperm.slane %v2429_v17, 1  ;;  %v818_v20 = vperm.slane %v2443_v39, 1  ;;  %v819_v52 = vperm.slane %v2445_v26, 1 }
 0x120   :  { %v788_v9 = vmul.f32 %v784_v61, %v782_v44  ;;  %v789_v50 = vmul.f32 %v785_v40, %v782_v44  ;;  %v790_v32 = vmul.f32 %v786_v24, %v782_v44  ;;  %v791_v41 = vmul.f32 %v787_v37, %v782_v44 }
 0x121   :  { %v820_v54 = vmul.f32 %v816_v55, %v814_v62  ;;  %v800_v35 = vperm.slane %v2427_v53, 0  ;;  %v801_v51 = vperm.slane %v2429_v17, 0  ;;  %v802_v1 = vperm.slane %v2443_v39, 0 }
 0x122   :  { %v750_v4 = vpop.permute.xlu1 %749  ;;  %v803_v23 = vperm.slane %v2445_v26, 0  ;;  %v821_v6 = vmul.f32 %v817_v38, %v814_v62  ;;  %v822_v46 = vmul.f32 %v818_v20, %v814_v62  ;;  %v851_v61 = vperm.slane %v2445_v26, 3 }
 0x123   :  { %v756_v34 = vmul.f32 %v752_v7, %v750_v4  ;;  %v757_v18 = vmul.f32 %v753_v33, %v750_v4  ;;  %v758_v3 = vmul.f32 %v754_v8, %v750_v4  ;;  %v759_v45 = vmul.f32 %v755_v12, %v750_v4 }
 0x124   :  { %v867_v12 = vperm.slane %v2445_v26, 4  ;;  %v894_v40 = vpop.permute.xlu2 %893  ;;  %v855_v44 = vmul.f32 %v851_v61, %v846_v49 }
 0x125   :  { %v760_v14 = vadd.f32 %v756_v34, %v744_v43  ;;  %v761_v2 = vadd.f32 %v757_v18, %v745_v56  ;;  %v762_v30 = vadd.f32 %v758_v3, %v746_v25  ;;  %v763_v27 = vadd.f32 %v759_v45, %v747_v31 }
 0x126   :  { %v864_v43 = vperm.slane %v2427_v53, 4  ;;  %v865_v56 = vperm.slane %v2429_v17, 4  ;;  %v866_v25 = vperm.slane %v2443_v39, 4  ;;  %v834_v31 = vperm.slane %v2443_v39, 2 }
 0x127   :  { %v776_v63 = vadd.f32 %v772_v42, %v760_v14  ;;  %v777_v29 = vadd.f32 %v773_v5, %v761_v2  ;;  %v778_v11 = vadd.f32 %v774_v0, %v762_v30  ;;  %v779_v13 = vadd.f32 %v775_v60, %v763_v27  ;;  %v862_v14 = vpop.permute.xlu0 %861 }
 0x128   :  { %v1832_v5 = vmov 56   ;;  %v823_v0 = vmul.f32 %v819_v52, %v814_v62  ;;  %v832_v62 = vperm.slane %v2427_v53, 2  ;;  %v835_v34 = vperm.slane %v2445_v26, 2 }
 0x129   :  { %v792_v15 = vadd.f32 %v788_v9, %v776_v63  ;;  %v793_v16 = vadd.f32 %v789_v50, %v777_v29  ;;  %v794_v22 = vadd.f32 %v790_v32, %v778_v11  ;;  %v795_v19 = vadd.f32 %v791_v41, %v779_v13  ;;  %1731 = vset.pattern.permute.xlu2 %v1832_v5 }
 0x12a   :  { %1233 = vperm.xlu2 %1731, %v2299_v59   ;;  %1732 = vset.pattern.permute.xlu0 %v1832_v5  ;;  %v833_v59 = vperm.slane %v2429_v17, 2  ;;  %v848_v18 = vperm.slane %v2427_v53, 3  ;;  %v849_v3 = vperm.slane %v2429_v17, 3  ;;  %v850_v45 = vperm.slane %v2443_v39, 3 }
 0x12b   :  { %v798_v21 = vpop.permute.xlu1 %797  ;;  %v868_v52 = vmul.f32 %v864_v43, %v862_v14  ;;  %v870_v13 = vmul.f32 %v866_v25, %v862_v14  ;;  %v871_v9 = vmul.f32 %v867_v12, %v862_v14 }
 0x12c   :  { %v804_v47 = vmul.f32 %v800_v35, %v798_v21  ;;  %v805_v58 = vmul.f32 %v801_v51, %v798_v21  ;;  %v806_v36 = vmul.f32 %v802_v1, %v798_v21  ;;  %v807_v42 = vmul.f32 %v803_v23, %v798_v21 }
 0x12d   :  { %v852_v55 = vmul.f32 %v848_v18, %v846_v49  ;;  %v853_v38 = vmul.f32 %v849_v3, %v846_v49  ;;  %v854_v27 = vmul.f32 %v850_v45, %v846_v49  ;;  %v926_v21 = vpop.permute.xlu2 %925  ;;  %v881_v49 = vperm.slane %v2429_v17, 5 }
 0x12e   :  { %v808_v10 = vadd.f32 %v804_v47, %v792_v15  ;;  %v809_v57 = vadd.f32 %v805_v58, %v793_v16  ;;  %v810_v48 = vadd.f32 %v806_v36, %v794_v22  ;;  %v811_v28 = vadd.f32 %v807_v42, %v795_v19 }
 0x12f   :  { %v880_v16 = vperm.slane %v2427_v53, 5  ;;  %v882_v22 = vperm.slane %v2443_v39, 5  ;;  %v883_v19 = vperm.slane %v2445_v26, 5  ;;  %v896_v47 = vperm.slane %v2427_v53, 6 }
 0x130   :  { %v824_v7 = vadd.f32 %v820_v54, %v808_v10  ;;  %v825_v33 = vadd.f32 %v821_v6, %v809_v57  ;;  %v826_v8 = vadd.f32 %v822_v46, %v810_v48  ;;  %v827_v4 = vadd.f32 %v823_v0, %v811_v28 }
 0x131   :  { %v869_v54 = vmul.f32 %v865_v56, %v862_v14  ;;  %v897_v58 = vperm.slane %v2429_v17, 6  ;;  %v898_v36 = vperm.slane %v2443_v39, 6  ;;  %v899_v42 = vperm.slane %v2445_v26, 6 }
 0x132   :  { %v900_v57 = vmul.f32 %v896_v47, %v894_v40  ;;  %v914_v18 = vperm.slane %v2443_v39, 7  ;;  %v915_v3 = vperm.slane %v2445_v26, 7  ;;  %v942_v39 = vpop.permute.xlu0 %941 }
 0x133   :  { %v901_v48 = vmul.f32 %v897_v58, %v894_v40  ;;  %v902_v28 = vmul.f32 %v898_v36, %v894_v40 }
 0x134   :  { %v830_v24 = vpop.permute.xlu1 %829 }
 0x135   :  { %v836_v2 = vmul.f32 %v832_v62, %v830_v24  ;;  %v837_v30 = vmul.f32 %v833_v59, %v830_v24  ;;  %v838_v37 = vmul.f32 %v834_v31, %v830_v24  ;;  %v839_v60 = vmul.f32 %v835_v34, %v830_v24 }
 0x136   :  { %v2498_v59 = vpop.permute.xlu2 %969  ;;  %v912_v31 = vperm.slane %v2427_v53, 7  ;;  %v913_v34 = vperm.slane %v2429_v17, 7 }
 0x137   :  { %v840_v20 = vadd.f32 %v836_v2, %v824_v7  ;;  %v841_v63 = vadd.f32 %v837_v30, %v825_v33  ;;  %v842_v29 = vadd.f32 %v838_v37, %v826_v8  ;;  %v843_v11 = vadd.f32 %v839_v60, %v827_v4 }
 0x138   :  { %v903_v7 = vmul.f32 %v899_v42, %v894_v40 }
 0x139   :  { %v856_v50 = vadd.f32 %v852_v55, %v840_v20  ;;  %v857_v32 = vadd.f32 %v853_v38, %v841_v63  ;;  %v858_v41 = vadd.f32 %v854_v27, %v842_v29  ;;  %v859_v35 = vadd.f32 %v855_v44, %v843_v11 }
 0x13b   :  { %v872_v15 = vadd.f32 %v868_v52, %v856_v50  ;;  %v873_v51 = vadd.f32 %v869_v54, %v857_v32  ;;  %v874_v1 = vadd.f32 %v870_v13, %v858_v41  ;;  %v875_v23 = vadd.f32 %v871_v9, %v859_v35 }
 0x13d   :  { %v878_v5 = vpop.permute.xlu1 %877 }
 0x13e   :  { %v884_v6 = vmul.f32 %v880_v16, %v878_v5  ;;  %v885_v46 = vmul.f32 %v881_v49, %v878_v5  ;;  %v886_v0 = vmul.f32 %v882_v22, %v878_v5  ;;  %v887_v10 = vmul.f32 %v883_v19, %v878_v5 }
 0x13f   :  { %v1002_v52 = vpop.permute.xlu2 %1001 }
 0x140   :  { %v888_v33 = vadd.f32 %v884_v6, %v872_v15  ;;  %v889_v8 = vadd.f32 %v885_v46, %v873_v51  ;;  %v890_v4 = vadd.f32 %v886_v0, %v874_v1  ;;  %v891_v43 = vadd.f32 %v887_v10, %v875_v23 }
 0x142   :  { %v904_v56 = vadd.f32 %v900_v57, %v888_v33  ;;  %v905_v25 = vadd.f32 %v901_v48, %v889_v8  ;;  %v906_v12 = vadd.f32 %v902_v28, %v890_v4  ;;  %v907_v62 = vadd.f32 %v903_v7, %v891_v43 }
 0x146   :  { %v910_v45 = vpop.permute.xlu1 %909 }
 0x147   :  { %v916_v61 = vmul.f32 %v912_v31, %v910_v45  ;;  %v917_v40 = vmul.f32 %v913_v34, %v910_v45  ;;  %v918_v24 = vmul.f32 %v914_v18, %v910_v45  ;;  %v919_v14 = vmul.f32 %v915_v3, %v910_v45 }
 0x149   :  { %v920_v2 = vadd.f32 %v916_v61, %v904_v56  ;;  %v921_v30 = vadd.f32 %v917_v40, %v905_v25  ;;  %v922_v37 = vadd.f32 %v918_v24, %v906_v12  ;;  %v923_v60 = vadd.f32 %v919_v14, %v907_v62  ;;  %v1050_v12 = vpop.permute.xlu2 %1049  ;;  %v1018_v62 = vpop.permute.xlu0 %1017 }
 0x14b   :  { %v928_v55 = vadd.f32 %v926_v21, %v920_v2  ;;  %v929_v38 = vadd.f32 %v926_v21, %v921_v30  ;;  %v930_v27 = vadd.f32 %v926_v21, %v922_v37  ;;  %v931_v44 = vadd.f32 %v926_v21, %v923_v60 }
 0x14d   :  { %v932_v53 = vmul.f32 0.01, %v928_v55  ;;  %v933_v20 = vmul.f32 0.01, %v929_v38  ;;  %v934_v17 = vmul.f32 0.01, %v930_v27 }
 0x14e   :  { %v935_v63 = vmul.f32 0.01, %v931_v44 }
 0x14f   :  { %v2504_v29 = vmax.f32 %v928_v55, %v932_v53  ;;  %v2506_v26 = vmax.f32 %v929_v38, %v933_v20  ;;  %v2508_v11 = vmax.f32 %v930_v27, %v934_v17  ;;  %v954_v54 = vpop.permute.xlu1 %953 }
 0x150   :  { %v2510_v13 = vmax.f32 %v931_v44, %v935_v63 }
 0x151   :  { %v1004_v9 = vperm.slane %v2504_v29, 4  ;;  %v1005_v50 = vperm.slane %v2506_v26, 4  ;;  %v1006_v32 = vperm.slane %v2508_v11, 4  ;;  %v944_v41 = vperm.slane %v2504_v29, 0 }
 0x152   :  { %v1007_v35 = vperm.slane %v2510_v13, 4  ;;  %v945_v15 = vperm.slane %v2506_v26, 0  ;;  %v946_v51 = vperm.slane %v2508_v11, 0  ;;  %v947_v1 = vperm.slane %v2510_v13, 0 }
 0x153   :  { %v948_v23 = vmul.f32 %v944_v41, %v942_v39  ;;  %v956_v22 = vperm.slane %v2504_v29, 1  ;;  %v957_v19 = vperm.slane %v2506_v26, 1  ;;  %v958_v47 = vperm.slane %v2508_v11, 1 }
 0x154   :  { %v949_v21 = vmul.f32 %v945_v15, %v942_v39  ;;  %v950_v16 = vmul.f32 %v946_v51, %v942_v39  ;;  %v951_v49 = vmul.f32 %v947_v1, %v942_v39  ;;  %v959_v58 = vperm.slane %v2510_v13, 1 }
 0x155   :  { %v1008_v36 = vmul.f32 %v1004_v9, %v1002_v52  ;;  %v1009_v42 = vmul.f32 %v1005_v50, %v1002_v52  ;;  %v1010_v5 = vmul.f32 %v1006_v32, %v1002_v52  ;;  %v1011_v6 = vmul.f32 %v1007_v35, %v1002_v52 }
 0x156   :  { %v960_v46 = vmul.f32 %v956_v22, %v954_v54  ;;  %v961_v0 = vmul.f32 %v957_v19, %v954_v54  ;;  %v962_v10 = vmul.f32 %v958_v47, %v954_v54  ;;  %v963_v57 = vmul.f32 %v959_v58, %v954_v54 }
 0x157   :  { %v1052_v48 = vperm.slane %v2504_v29, 7  ;;  %v1053_v28 = vperm.slane %v2506_v26, 7  ;;  %v1054_v7 = vperm.slane %v2508_v11, 7  ;;  %v1055_v33 = vperm.slane %v2510_v13, 7 }
 0x158   :  { %v986_v8 = vpop.permute.xlu1 %985  ;;  %v964_v4 = vadd.f32 %v960_v46, %v948_v23  ;;  %v965_v43 = vadd.f32 %v961_v0, %v949_v21  ;;  %v966_v56 = vadd.f32 %v962_v10, %v950_v16  ;;  %v967_v25 = vadd.f32 %v963_v57, %v951_v49  ;;  %v1082_v23 = vpop.permute.xlu2 %1081 }
 0x159   :  { %v1020_v31 = vperm.slane %v2504_v29, 5  ;;  %v1021_v34 = vperm.slane %v2506_v26, 5  ;;  %v1022_v18 = vperm.slane %v2508_v11, 5  ;;  %v1023_v3 = vperm.slane %v2510_v13, 5 }
 0x15a   :  { %v972_v45 = vperm.slane %v2504_v29, 2  ;;  %v973_v61 = vperm.slane %v2506_v26, 2  ;;  %v974_v40 = vperm.slane %v2508_v11, 2  ;;  %v975_v24 = vperm.slane %v2510_v13, 2 }
 0x15b   :  { %v1024_v14 = vmul.f32 %v1020_v31, %v1018_v62  ;;  %v1025_v2 = vmul.f32 %v1021_v34, %v1018_v62  ;;  %v1026_v30 = vmul.f32 %v1022_v18, %v1018_v62  ;;  %v1027_v37 = vmul.f32 %v1023_v3, %v1018_v62 }
 0x15c   :  { %v976_v60 = vmul.f32 %v972_v45, %v2498_v59  ;;  %v977_v55 = vmul.f32 %v973_v61, %v2498_v59  ;;  %v978_v38 = vmul.f32 %v974_v40, %v2498_v59  ;;  %v979_v27 = vmul.f32 %v975_v24, %v2498_v59 }
 0x15d   :  { %v988_v44 = vperm.slane %v2504_v29, 3  ;;  %v989_v53 = vperm.slane %v2506_v26, 3  ;;  %v990_v20 = vperm.slane %v2508_v11, 3  ;;  %v991_v17 = vperm.slane %v2510_v13, 3 }
 0x15e   :  { %v980_v63 = vadd.f32 %v976_v60, %v964_v4  ;;  %v981_v39 = vadd.f32 %v977_v55, %v965_v43  ;;  %v982_v52 = vadd.f32 %v978_v38, %v966_v56  ;;  %v983_v54 = vadd.f32 %v979_v27, %v967_v25 }
 0x15f   :  { %v992_v9 = vmul.f32 %v988_v44, %v986_v8  ;;  %v993_v50 = vmul.f32 %v989_v53, %v986_v8  ;;  %v994_v32 = vmul.f32 %v990_v20, %v986_v8  ;;  %v995_v41 = vmul.f32 %v991_v17, %v986_v8  ;;  %v1090_v44 = vpop.permute.xlu0 %1089 }
 0x160   :  { %v1036_v15 = vperm.slane %v2504_v29, 6  ;;  %v1037_v59 = vperm.slane %v2506_v26, 6  ;;  %v1038_v51 = vperm.slane %v2508_v11, 6  ;;  %v1039_v1 = vperm.slane %v2510_v13, 6 }
 0x161   :  { %v1034_v35 = vpop.permute.xlu1 %1033  ;;  %v996_v21 = vadd.f32 %v992_v9, %v980_v63  ;;  %v997_v16 = vadd.f32 %v993_v50, %v981_v39  ;;  %v998_v49 = vadd.f32 %v994_v32, %v982_v52  ;;  %v999_v22 = vadd.f32 %v995_v41, %v983_v54 }
 0x162   :  { %v1040_v19 = vmul.f32 %v1036_v15, %v1034_v35  ;;  %v1041_v47 = vmul.f32 %v1037_v59, %v1034_v35  ;;  %v1042_v58 = vmul.f32 %v1038_v51, %v1034_v35  ;;  %v1043_v46 = vmul.f32 %v1039_v1, %v1034_v35 }
 0x163   :  { %v1012_v0 = vadd.f32 %v1008_v36, %v996_v21  ;;  %v1013_v10 = vadd.f32 %v1009_v42, %v997_v16  ;;  %v1014_v57 = vadd.f32 %v1010_v5, %v998_v49  ;;  %v1015_v8 = vadd.f32 %v1011_v6, %v999_v22  ;;  %v2548_v42 = vpop.permute.xlu2 %1133 }
 0x164   :  { %v1056_v11 = vmul.f32 %v1052_v48, %v1050_v12  ;;  %v1057_v56 = vmul.f32 %v1053_v28, %v1050_v12  ;;  %v1058_v13 = vmul.f32 %v1054_v7, %v1050_v12  ;;  %v1059_v25 = vmul.f32 %v1055_v33, %v1050_v12 }
 0x165   :  { %v1028_v29 = vadd.f32 %v1024_v14, %v1012_v0  ;;  %v1029_v4 = vadd.f32 %v1025_v2, %v1013_v10  ;;  %v1030_v26 = vadd.f32 %v1026_v30, %v1014_v57  ;;  %v1031_v43 = vadd.f32 %v1027_v37, %v1015_v8 }
 0x167   :  { %v1044_v62 = vadd.f32 %v1040_v19, %v1028_v29  ;;  %v1045_v31 = vadd.f32 %v1041_v47, %v1029_v4  ;;  %v1046_v34 = vadd.f32 %v1042_v58, %v1030_v26  ;;  %v1047_v18 = vadd.f32 %v1043_v46, %v1031_v43 }
 0x169   :  { %v1060_v45 = vadd.f32 %v1056_v11, %v1044_v62  ;;  %v1061_v61 = vadd.f32 %v1057_v56, %v1045_v31  ;;  %v1062_v40 = vadd.f32 %v1058_v13, %v1046_v34  ;;  %v1063_v36 = vadd.f32 %v1059_v25, %v1047_v18 }
 0x16a   :  { %v1066_v3 = vpop.permute.xlu1 %1065 }
 0x16b   :  { %v1068_v5 = vadd.f32 %v1066_v3, %v1060_v45  ;;  %v1069_v6 = vadd.f32 %v1066_v3, %v1061_v61  ;;  %v1070_v24 = vadd.f32 %v1066_v3, %v1062_v40  ;;  %v1071_v14 = vadd.f32 %v1066_v3, %v1063_v36  ;;  %v1174_v54 = vpop.permute.xlu2 %1173  ;;  %v1194_v61 = vpop.permute.xlu0 %1193 }
 0x16d   :  { %v1072_v2 = vmul.f32 0.01, %v1068_v5  ;;  %v1073_v48 = vmul.f32 0.01, %v1069_v6  ;;  %v1074_v28 = vmul.f32 0.01, %v1070_v24 }
 0x16e   :  { %v1075_v7 = vmul.f32 0.01, %v1071_v14 }
 0x16f   :  { %v2550_v33 = vmax.f32 %v1068_v5, %v1072_v2  ;;  %v2552_v12 = vmax.f32 %v1069_v6, %v1073_v48  ;;  %v2554_v30 = vmax.f32 %v1070_v24, %v1074_v28 }
 0x170   :  { %v2556_v37 = vmax.f32 %v1071_v14, %v1075_v7 }
 0x171   :  { %v1096_v60 = vrot.slane %v2550_v33, 1  ;;  %v1097_v55 = vrot.slane %v2552_v12, 1  ;;  %v1098_v38 = vrot.slane %v2554_v30, 1  ;;  %v1176_v17 = vrot.slane %v2550_v33, 5 }
 0x172   :  { %v1099_v27 = vrot.slane %v2556_v37, 1  ;;  %v1084_v63 = vmul.f32 %v1082_v23, %v2550_v33  ;;  %v1085_v9 = vmul.f32 %v1082_v23, %v2552_v12  ;;  %v1086_v50 = vmul.f32 %v1082_v23, %v2554_v30 }
 0x173   :  { %v1114_v53 = vpop.permute.xlu1 %1113  ;;  %v1104_v20 = vmul.f32 %v1096_v60, %v1090_v44  ;;  %v1105_v39 = vmul.f32 %v1097_v55, %v1090_v44  ;;  %v1106_v52 = vmul.f32 %v1098_v38, %v1090_v44  ;;  %v1177_v41 = vrot.slane %v2552_v12, 5 }
 0x174   :  { %v1107_v32 = vmul.f32 %v1099_v27, %v1090_v44  ;;  %v1087_v35 = vmul.f32 %v1082_v23, %v2556_v37  ;;  %v1178_v15 = vrot.slane %v2554_v30, 5  ;;  %v1179_v59 = vrot.slane %v2556_v37, 5 }
 0x175   :  { %v1108_v51 = vadd.f32 %v1104_v20, %v1084_v63  ;;  %v1109_v1 = vadd.f32 %v1105_v39, %v1085_v9  ;;  %v1110_v21 = vadd.f32 %v1106_v52, %v1086_v50  ;;  %v1184_v16 = vmul.f32 %v1176_v17, %v1174_v54 }
 0x176   :  { %v1116_v49 = vrot.slane %v2550_v33, 2  ;;  %v1117_v22 = vrot.slane %v2552_v12, 2  ;;  %v1118_v19 = vrot.slane %v2554_v30, 2  ;;  %v1119_v47 = vrot.slane %v2556_v37, 2 }
 0x177   :  { %v1111_v58 = vadd.f32 %v1107_v32, %v1087_v35  ;;  %v1185_v46 = vmul.f32 %v1177_v41, %v1174_v54  ;;  %v1196_v23 = vrot.slane %v2550_v33, 6  ;;  %v1197_v0 = vrot.slane %v2552_v12, 6 }
 0x178   :  { %v1124_v10 = vmul.f32 %v1116_v49, %v1114_v53  ;;  %v1125_v57 = vmul.f32 %v1117_v22, %v1114_v53  ;;  %v1126_v8 = vmul.f32 %v1118_v19, %v1114_v53  ;;  %v1127_v29 = vmul.f32 %v1119_v47, %v1114_v53 }
 0x179   :  { %v1136_v26 = vrot.slane %v2550_v33, 3  ;;  %v1137_v43 = vrot.slane %v2552_v12, 3  ;;  %v1138_v11 = vrot.slane %v2554_v30, 3  ;;  %v1139_v56 = vrot.slane %v2556_v37, 3 }
 0x17a   :  { %v1198_v13 = vrot.slane %v2554_v30, 6  ;;  %v1128_v25 = vadd.f32 %v1124_v10, %v1108_v51  ;;  %v1129_v62 = vadd.f32 %v1125_v57, %v1109_v1  ;;  %v1130_v31 = vadd.f32 %v1126_v8, %v1110_v21 }
 0x17b   :  { %v1131_v34 = vadd.f32 %v1127_v29, %v1111_v58  ;;  %v1144_v18 = vmul.f32 %v1136_v26, %v2548_v42  ;;  %v1145_v3 = vmul.f32 %v1137_v43, %v2548_v42  ;;  %v1146_v45 = vmul.f32 %v1138_v11, %v2548_v42 }
 0x17c   :  { %v1154_v4 = vpop.permute.xlu1 %1153  ;;  %v1156_v40 = vrot.slane %v2550_v33, 4  ;;  %v1157_v36 = vrot.slane %v2552_v12, 4  ;;  %v1158_v5 = vrot.slane %v2554_v30, 4  ;;  %v1159_v6 = vrot.slane %v2556_v37, 4 }
 0x17d   :  { %v1147_v24 = vmul.f32 %v1139_v56, %v2548_v42  ;;  %v1148_v14 = vadd.f32 %v1144_v18, %v1128_v25  ;;  %v1149_v2 = vadd.f32 %v1145_v3, %v1129_v62  ;;  %v1150_v48 = vadd.f32 %v1146_v45, %v1130_v31 }
 0x17e   :  { %v1164_v28 = vmul.f32 %v1156_v40, %v1154_v4  ;;  %v1165_v7 = vmul.f32 %v1157_v36, %v1154_v4  ;;  %v1166_v60 = vmul.f32 %v1158_v5, %v1154_v4  ;;  %v1167_v55 = vmul.f32 %v1159_v6, %v1154_v4 }
 0x17f   :  { %v1186_v38 = vmul.f32 %v1178_v15, %v1174_v54  ;;  %v1187_v27 = vmul.f32 %v1179_v59, %v1174_v54  ;;  %v1204_v44 = vmul.f32 %v1196_v23, %v1194_v61  ;;  %v1151_v53 = vadd.f32 %v1147_v24, %v1131_v34 }
 0x180   :  { %v1205_v20 = vmul.f32 %v1197_v0, %v1194_v61  ;;  %v1168_v17 = vadd.f32 %v1164_v28, %v1148_v14  ;;  %v1169_v63 = vadd.f32 %v1165_v7, %v1149_v2  ;;  %v1170_v39 = vadd.f32 %v1166_v60, %v1150_v48 }
 0x181   :  { %v1171_v52 = vadd.f32 %v1167_v55, %v1151_v53  ;;  %v1216_v9 = vrot.slane %v2550_v33, 7  ;;  %v1217_v42 = vrot.slane %v2552_v12, 7  ;;  %v1218_v50 = vrot.slane %v2554_v30, 7 }
 0x182   :  { %v1206_v32 = vmul.f32 %v1198_v13, %v1194_v61  ;;  %v1188_v41 = vadd.f32 %v1184_v16, %v1168_v17  ;;  %v1189_v35 = vadd.f32 %v1185_v46, %v1169_v63  ;;  %v1190_v51 = vadd.f32 %v1186_v38, %v1170_v39 }
 0x183   :  { %v1199_v54 = vrot.slane %v2556_v37, 6  ;;  %v1191_v47 = vadd.f32 %v1187_v27, %v1171_v52  ;;  %v1219_v33 = vrot.slane %v2556_v37, 7 }
 0x184   :  { %v1208_v49 = vadd.f32 %v1204_v44, %v1188_v41  ;;  %v1209_v22 = vadd.f32 %v1205_v20, %v1189_v35  ;;  %v1210_v19 = vadd.f32 %v1206_v32, %v1190_v51  ;;  %v1234_v58 = vpop.permute.xlu2 %1233 }
 0x185   :  { %v1214_v1 = vpop.permute.xlu1 %1213  ;;  %v1207_v0 = vmul.f32 %v1199_v54, %v1194_v61 }
 0x186   :  { %v1224_v15 = vmul.f32 %v1216_v9, %v1214_v1  ;;  %v1225_v59 = vmul.f32 %v1217_v42, %v1214_v1  ;;  %v1226_v21 = vmul.f32 %v1218_v50, %v1214_v1  ;;  %v1227_v16 = vmul.f32 %v1219_v33, %v1214_v1 }
 0x187   :  { %v1211_v8 = vadd.f32 %v1207_v0, %v1191_v47 }
 0x188   :  { %v1228_v12 = vadd.f32 %v1224_v15, %v1208_v49  ;;  %v1229_v23 = vadd.f32 %v1225_v59, %v1209_v22  ;;  %v1230_v30 = vadd.f32 %v1226_v21, %v1210_v19  ;;  %v1391_v49 = vlaneseq }
 0x189   :  { %v1231_v37 = vadd.f32 %v1227_v16, %v1211_v8 }
 0x18a   :  { %v2594_v46 = vadd.f32 %v1234_v58, %v1228_v12  ;;  %v2596_v10 = vadd.f32 %v1234_v58, %v1229_v23  ;;  %v2598_v57 = vadd.f32 %v1234_v58, %v1230_v30  ;;  %v1392_v22 = vshrl.u32 %v1391_v49, 7 }
 0x18b   :  { %v2603_v43 = vadd.f32 %v1234_v58, %v1231_v37  ;;  %v1397_v8 = vand.u32 127, %v1391_v49 }
 0x18c   :  { %v1320_v29 = vrot.slane %v2598_v57, 7  ;;  %v1270_v4 = vrot.slane %v2596_v10, 7  ;;  %v1241_v26 = vrot.slane %v2594_v46, 7  ;;  %v1274_v11 = vrot.slane %v2596_v10, 6 }
 0x18d   :  { %v1245_v56 = vrot.slane %v2594_v46, 6  ;;  %v1349_v13 = vrot.slane %v2603_v43, 7  ;;  %v1249_v25 = vrot.slane %v2594_v46, 5  ;;  %v1353_v62 = vrot.slane %v2603_v43, 6 }
 0x18e   :  { %1321 = vrot.lane.b32.xlu0 %v1320_v29, %s1833_s3  ;;  %1271 = vrot.lane.b32.xlu2 %v1270_v4, %s1833_s3  ;;  %v1324_v31 = vrot.slane %v2598_v57, 6  ;;  %v1357_v34 = vrot.slane %v2603_v43, 5  ;;  %v1328_v18 = vrot.slane %v2598_v57, 5  ;;  %v1278_v3 = vrot.slane %v2596_v10, 5 }
 0x18f   :  { %1242 = vrot.lane.b32.xlu1 %v1241_v26, %s1833_s3  ;;  %v1332_v45 = vrot.slane %v2598_v57, 4  ;;  %v1282_v61 = vrot.slane %v2596_v10, 4  ;;  %v1253_v40 = vrot.slane %v2594_v46, 4  ;;  %v1286_v36 = vrot.slane %v2596_v10, 3 }
 0x190   :  { %v1257_v5 = vrot.slane %v2594_v46, 3  ;;  %v1361_v6 = vrot.slane %v2603_v43, 4  ;;  %v1261_v24 = vrot.slane %v2594_v46, 2  ;;  %v1365_v14 = vrot.slane %v2603_v43, 3 }
 0x191   :  { %v1336_v2 = vrot.slane %v2598_v57, 3  ;;  %v1369_v48 = vrot.slane %v2603_v43, 2  ;;  %v1340_v28 = vrot.slane %v2598_v57, 2  ;;  %v1290_v7 = vrot.slane %v2596_v10, 2 }
 0x192   :  { %v1344_v60 = vrot.slane %v2598_v57, 1  ;;  %v1294_v55 = vrot.slane %v2596_v10, 1  ;;  %v1265_v38 = vrot.slane %v2594_v46, 1  ;;  %v1373_v27 = vrot.slane %v2603_v43, 1 }
 0x193   :  { %v1393_v12 = vadd.s32 8, %v1392_v22 }
 0x195   :  { %v1409_v29 = vand.u32 15, %v1393_v12 }
 0x196   :  { %1275 = vrot.lane.b32.xlu0 %v1274_v11, %s1834_s27  ;;  %1246 = vrot.lane.b32.xlu2 %v1245_v56, %s1834_s27  ;;  %v1394_v56 = vadd.s32 16, %v1392_v22 }
 0x197   :  { %1350 = vrot.lane.b32.xlu1 %v1349_v13, %s1833_s3  ;;  %vm1447_vm7 = vcmp.eq.s32.totalorder %v1409_v29, %v1397_v8 }
 0x19e   :  { %1250 = vrot.lane.b32.xlu0 %v1249_v25, %s1835_s28  ;;  %1354 = vrot.lane.b32.xlu2 %v1353_v62, %s1834_s27 }
 0x19f   :  { %1325 = vrot.lane.b32.xlu1 %v1324_v31, %s1834_s27 }
 0x1a6   :  { %1358 = vrot.lane.b32.xlu0 %v1357_v34, %s1835_s28  ;;  %1329 = vrot.lane.b32.xlu2 %v1328_v18, %s1835_s28 }
 0x1a7   :  { %1279 = vrot.lane.b32.xlu1 %v1278_v3, %s1835_s28 }
 0x1ae   :  { %1333 = vrot.lane.b32.xlu0 %v1332_v45, %s1836_s29  ;;  %1283 = vrot.lane.b32.xlu2 %v1282_v61, %s1836_s29  ;;  %v1416_v61 = vand.u32 15, %v1394_v56 }
 0x1af   :  { %1254 = vrot.lane.b32.xlu1 %v1253_v40, %s1836_s29 }
 0x1b0   :  { %vm1448_vm9 = vcmp.eq.s32.totalorder %v1416_v61, %v1397_v8 }
 0x1b6   :  { %1287 = vrot.lane.b32.xlu0 %v1286_v36, %s1837_s30  ;;  %1258 = vrot.lane.b32.xlu2 %v1257_v5, %s1837_s30  ;;  %v1402_v36 = vand.u32 15, %v1392_v22 }
 0x1b7   :  { %1362 = vrot.lane.b32.xlu1 %v1361_v6, %s1836_s29 }
 0x1b8   :  { %vm1446_vm10 = vcmp.eq.s32.totalorder %v1402_v36, %v1397_v8 }
 0x1be   :  { %1262 = vrot.lane.b32.xlu0 %v1261_v24, %s1838_s5  ;;  %1366 = vrot.lane.b32.xlu2 %v1365_v14, %s1837_s30 }
 0x1bf   :  { %1337 = vrot.lane.b32.xlu1 %v1336_v2, %s1837_s30 }
 0x1c6   :  { %1370 = vrot.lane.b32.xlu0 %v1369_v48, %s1838_s5  ;;  %1341 = vrot.lane.b32.xlu2 %v1340_v28, %s1838_s5 }
 0x1c7   :  { %1291 = vrot.lane.b32.xlu1 %v1290_v7, %s1838_s5 }
 0x1ce   :  { %1345 = vrot.lane.b32.xlu0 %v1344_v60, %s1839_s6  ;;  %1295 = vrot.lane.b32.xlu2 %v1294_v55, %s1839_s6 }
 0x1cf   :  { %1266 = vrot.lane.b32.xlu1 %v1265_v38, %s1839_s6  ;;  %v1395_v38 = vadd.s32 24, %v1392_v22 }
 0x1d7   :  { %1374 = vrot.lane.b32.xlu1 %v1373_v27, %s1839_s6 }
 0x1e8   :  { %v1272_v44 = vpop.permute.xlu2 %1271 }
 0x1e9   :  { %v1312_v58 = vsel %vm1298_vm0, %v2596_v10, %v1272_v44 }
 0x1f0   :  { %v1247_v53 = vpop.permute.xlu2 %1246 }
 0x1f8   :  { %v2630_v20 = vpop.permute.xlu2 %1354 }
 0x200   :  { %v1322_v17 = vpop.permute.xlu0 %1321  ;;  %v1330_v39 = vpop.permute.xlu2 %1329 }
 0x201   :  { %v1243_v63 = vpop.permute.xlu1 %1242  ;;  %v1377_v0 = vsel %vm1298_vm0, %v2598_v57, %v1322_v17 }
 0x202   :  { %v1299_v16 = vsel %vm1298_vm0, %v2594_v46, %v1243_v63 }
 0x203   :  { %v1301_v25 = vsel %vm1300_vm1, %v1299_v16, %v1247_v53 }
 0x208   :  { %v1276_v52 = vpop.permute.xlu0 %1275  ;;  %v1284_v32 = vpop.permute.xlu2 %1283 }
 0x209   :  { %v1351_v9 = vpop.permute.xlu1 %1350  ;;  %v1313_v23 = vsel %vm1300_vm1, %v1312_v58, %v1276_v52 }
 0x20a   :  { %v1384_v6 = vsel %vm1298_vm0, %v2603_v43, %v1351_v9  ;;  %v1423_v9 = vand.u32 15, %v1395_v38 }
 0x20b   :  { %v1385_v43 = vsel %vm1300_vm1, %v1384_v6, %v2630_v20  ;;  %v1556_v6 = vld [vmem:[%s2712_s2 + $0x8] sm:$0xff] }
 0x20c   :  { %vm1449_vm11 = vcmp.eq.s32.totalorder %v1423_v9, %v1397_v8  ;;  %v1557_v9 = vld [vmem:[%s2712_s2 + $0x10] sm:$0xff] }
 0x210   :  { %v1251_v42 = vpop.permute.xlu0 %1250  ;;  %v1259_v51 = vpop.permute.xlu2 %1258 }
 0x211   :  { %v1326_v50 = vpop.permute.xlu1 %1325  ;;  %v1303_v31 = vsel %vm1302_vm2, %v1301_v25, %v1251_v42 }
 0x212   :  { %v1378_v4 = vsel %vm1300_vm1, %v1377_v0, %v1326_v50 }
 0x213   :  { %v1379_v46 = vsel %vm1302_vm2, %v1378_v4, %v1330_v39 }
 0x218   :  { %v2632_v41 = vpop.permute.xlu0 %1358  ;;  %v2634_v15 = vpop.permute.xlu2 %1366 }
 0x219   :  { %v1280_v35 = vpop.permute.xlu1 %1279  ;;  %v1386_v44 = vsel %vm1302_vm2, %v1385_v43, %v2632_v41 }
 0x21a   :  { %v1314_v30 = vsel %vm1302_vm2, %v1313_v23, %v1280_v35 }
 0x21b   :  { %v1315_v10 = vsel %vm1304_vm3, %v1314_v30, %v1284_v32 }
 0x220   :  { %v1334_v1 = vpop.permute.xlu0 %1333  ;;  %v1342_v19 = vpop.permute.xlu2 %1341 }
 0x221   :  { %v1255_v54 = vpop.permute.xlu1 %1254  ;;  %v1380_v34 = vsel %vm1304_vm3, %v1379_v46, %v1334_v1 }
 0x222   :  { %v1305_v3 = vsel %vm1304_vm3, %v1303_v31, %v1255_v54 }
 0x223   :  { %v1307_v24 = vsel %vm1306_vm4, %v1305_v3, %v1259_v51 }
 0x228   :  { %v1288_v59 = vpop.permute.xlu0 %1287  ;;  %v1296_v13 = vpop.permute.xlu2 %1295 }
 0x229   :  { %v1363_v21 = vpop.permute.xlu1 %1362  ;;  %v1316_v37 = vsel %vm1306_vm4, %v1315_v10, %v1288_v59 }
 0x22a   :  { %v1387_v17 = vsel %vm1304_vm3, %v1386_v44, %v1363_v21 }
 0x22b   :  { %v1388_v42 = vsel %vm1306_vm4, %v1387_v17, %v2634_v15 }
 0x230   :  { %v1263_v47 = vpop.permute.xlu0 %1262 }
 0x231   :  { %v1338_v33 = vpop.permute.xlu1 %1337  ;;  %v1309_v48 = vsel %vm1308_vm6, %v1307_v24, %v1263_v47 }
 0x232   :  { %v1381_v45 = vsel %vm1306_vm4, %v1380_v34, %v1338_v33 }
 0x233   :  { %v1382_v2 = vsel %vm1308_vm6, %v1381_v45, %v1342_v19 }
 0x238   :  { %v1371_v26 = vpop.permute.xlu0 %1370 }
 0x239   :  { %v1292_v11 = vpop.permute.xlu1 %1291  ;;  %v1389_v20 = vsel %vm1308_vm6, %v1388_v42, %v1371_v26 }
 0x23a   :  { %v1317_v57 = vsel %vm1308_vm6, %v1316_v37, %v1292_v11 }
 0x23b   :  { %v1318_v62 = vsel %vm1310_vm5, %v1317_v57, %v1296_v13 }
 0x23c   :  { %v1586_v18 = vadd.f32 -1e+08, %v1318_v62 }
 0x23e   :  { %v1455_v40 = vsel %vm1447_vm7, %v1586_v18, %v1318_v62 }
 0x23f   :  { %v1462_v5 = vsel %vm1458_vm8, %v1455_v40, -inf }
 0x240   :  { %1463 = vmax.xlane.f32.xlu0 %v1462_v5  ;;  %v1346_v14 = vpop.permute.xlu0 %1345 }
 0x241   :  { %v1383_v28 = vsel %vm1310_vm5, %v1382_v2, %v1346_v14  ;;  %v1267_v7 = vpop.permute.xlu1 %1266 }
 0x242   :  { %v1587_v60 = vadd.f32 -1e+08, %v1383_v28  ;;  %v1311_v55 = vsel %vm1310_vm5, %v1309_v48, %v1267_v7 }
 0x243   :  { %v1585_v27 = vadd.f32 -1e+08, %v1311_v55 }
 0x244   :  { %v1456_v53 = vsel %vm1448_vm9, %v1587_v60, %v1383_v28 }
 0x245   :  { %v1465_v63 = vsel %vm1458_vm8, %v1456_v53, -inf  ;;  %v1454_v39 = vsel %vm1446_vm10, %v1585_v27, %v1311_v55 }
 0x246   :  { %1466 = vmax.xlane.f32.xlu1 %v1465_v63  ;;  %v1459_v52 = vsel %vm1458_vm8, %v1454_v39, -inf }
 0x247   :  { %1460 = vmax.xlane.f32.xlu2 %v1459_v52 }
 0x249   :  { %v1375_v50 = vpop.permute.xlu1 %1374 }
 0x24a   :  { %v1390_v32 = vsel %vm1310_vm5, %v1389_v20, %v1375_v50  ;;  %v1555_v50 = vld [vmem:[%s2712_s2] sm:$0xff] }
 0x24b   :  { %v1588_v41 = vadd.f32 -1e+08, %v1390_v32 }
 0x24d   :  { %v1457_v35 = vsel %vm1449_vm11, %v1588_v41, %v1390_v32 }
 0x24e   :  { %v1468_v51 = vsel %vm1458_vm8, %v1457_v35, -inf }
 0x24f   :  { %1469 = vmax.xlane.f32.xlu2 %v1468_v51 }
 0x2b3   :  { %v1464_v1 = vpop.xlane.xlu0 %1463 }
 0x2b4   :  { %v1472_v54 = vsub.f32 %v1455_v40, %v1464_v1 }
 0x2b6   :  { %v1477_v59 = vmul.f32 1.442695, %v1472_v54 }
 0x2b8   :  { %1733 = vpow2.f32 %v1477_v59 }
 0x2b9   :  { %v1467_v21 = vpop.xlane.xlu1 %1466 }
 0x2ba   :  { %v1461_v49 = vpop.xlane.xlu2 %1460  ;;  %v1473_v22 = vsub.f32 %v1456_v53, %v1467_v21 }
 0x2bb   :  { %v1471_v19 = vsub.f32 %v1454_v39, %v1461_v49 }
 0x2bc   :  { %v1479_v15 = vmul.f32 1.442695, %v1473_v22 }
 0x2bd   :  { %v1475_v47 = vmul.f32 1.442695, %v1471_v19 }
 0x2be   :  { %v1734_v33 = vpop.eup %1733  ;;  %1735 = vpow2.f32 %v1479_v15 }
 0x2bf   :  { %1737 = vpow2.f32 %v1475_v47  ;;  %v1486_v58 = vsel %vm1458_vm8, %v1734_v33, 0.0  ;;  %v1558_v47 = vld [vmem:[%s2712_s2 + $0x18] sm:$0xff] }
 0x2c0   :  { %1487 = vadd.xlane.f32.xlu0 %v1486_v58 }
 0x2c2   :  { %v1470_v12 = vpop.xlane.xlu2 %1469 }
 0x2c3   :  { %v1474_v23 = vsub.f32 %v1457_v35, %v1470_v12 }
 0x2c4   :  { %v2676_v30 = vpop.eup %1735 }
 0x2c5   :  { %v2678_v0 = vpop.eup %1737  ;;  %v1481_v16 = vmul.f32 1.442695, %v1474_v23  ;;  %v1489_v8 = vsel %vm1458_vm8, %v2676_v30, 0.0 }
 0x2c6   :  { %v1483_v29 = vsel %vm1458_vm8, %v2678_v0, 0.0  ;;  %1490 = vadd.xlane.f32.xlu1 %v1489_v8 }
 0x2c7   :  { %1739 = vpow2.f32 %v1481_v16  ;;  %1484 = vadd.xlane.f32.xlu2 %v1483_v29 }
 0x2cd   :  { %v2684_v4 = vpop.eup %1739 }
 0x2ce   :  { %v1492_v10 = vsel %vm1458_vm8, %v2684_v4, 0.0 }
 0x2cf   :  { %1493 = vadd.xlane.f32.xlu2 %v1492_v10 }
 0x333   :  { %v1488_v26 = vpop.xlane.xlu0 %1487 }
 0x334   :  { %1741 = vrcp.f32 %v1488_v26  ;;  %v1521_v25 = vand.u32 2147483648, %v1488_v26  ;;  %v1519_v62 = vand.u32 2147483647, %v1488_v26  ;;  %vm1515_vm13 = vweird.f32 %v1488_v26 }
 0x336   :  { %v1522_v45 = vor.u32 1.1754944e-38, %v1521_v25  ;;  %vm1520_vm15 = vcmp.eq.f32.partialorder %v1519_v62, 8.507059e+37 }
 0x339   :  { %v1491_v37 = vpop.xlane.xlu1 %1490 }
 0x33a   :  { %v1742_v11 = vpop.eup %1741  ;;  %v1485_v56 = vpop.xlane.xlu2 %1484  ;;  %1743 = vrcp.f32 %v1491_v37  ;;  %v1534_v2 = vand.u32 2147483647, %v1491_v37  ;;  %v1536_v48 = vand.u32 2147483648, %v1491_v37  ;;  %vm1530_vm2 = vweird.f32 %v1491_v37 }
 0x33b   :  { %v1511_v13 = vmul.f32 %v1742_v11, %v1488_v26  ;;  %1745 = vrcp.f32 %v1485_v56  ;;  %vm1516_vm12 = vweird.f32 %v1742_v11  ;;  %v1506_v7 = vand.u32 2147483648, %v1485_v56 }
 0x33c   :  { %vm1517_vm14 = vmor %vm1515_vm13, %vm1516_vm12  ;;  %v1504_v38 = vand.u32 2147483647, %v1485_v56  ;;  %vm1500_vm3 = vweird.f32 %v1485_v56  ;;  %v1537_v53 = vor.u32 1.1754944e-38, %v1536_v48  ;;  %vm1535_vm6 = vcmp.eq.f32.partialorder %v1534_v2, 8.507059e+37 }
 0x33d   :  { %v1512_v57 = vsub.f32 1.0, %v1511_v13  ;;  %v1507_v63 = vor.u32 1.1754944e-38, %v1506_v7 }
 0x33e   :  { %vm1505_vm7 = vcmp.eq.f32.partialorder %v1504_v38, 8.507059e+37 }
 0x33f   :  { %v1513_v46 = vmul.f32 %v1742_v11, %v1512_v57 }
 0x340   :  { %v1744_v31 = vpop.eup %1743 }
 0x341   :  { %v1746_v34 = vpop.eup %1745  ;;  %v1514_v18 = vadd.f32 %v1742_v11, %v1513_v46  ;;  %v1526_v3 = vmul.f32 %v1744_v31, %v1491_v37  ;;  %vm1531_vm0 = vweird.f32 %v1744_v31 }
 0x342   :  { %v1496_v61 = vmul.f32 %v1746_v34, %v1485_v56  ;;  %v1494_v40 = vpop.xlane.xlu2 %1493  ;;  %vm1501_vm1 = vweird.f32 %v1746_v34  ;;  %vm1532_vm4 = vmor %vm1530_vm2, %vm1531_vm0 }
 0x343   :  { %v1518_v36 = vsel %vm1517_vm14, %v1742_v11, %v1514_v18  ;;  %v1527_v5 = vsub.f32 1.0, %v1526_v3  ;;  %1747 = vrcp.f32 %v1494_v40  ;;  %vm1502_vm5 = vmor %vm1500_vm3, %vm1501_vm1  ;;  %v1551_v54 = vand.u32 2147483648, %v1494_v40 }
 0x344   :  { %v1523_v24 = vsel %vm1520_vm15, %v1522_v45, %v1518_v36  ;;  %v1497_v14 = vsub.f32 1.0, %v1496_v61  ;;  %v1549_v49 = vand.u32 2147483647, %v1494_v40  ;;  %vm1545_vm10 = vweird.f32 %v1494_v40 }
 0x345   :  { %v1524_v28 = vmul.f32 %v1734_v33, %v1523_v24  ;;  %v1528_v60 = vmul.f32 %v1744_v31, %v1527_v5  ;;  %v1552_v19 = vor.u32 1.1754944e-38, %v1551_v54 }
 0x346   :  { %v1498_v55 = vmul.f32 %v1746_v34, %v1497_v14  ;;  %vm1550_vm12 = vcmp.eq.f32.partialorder %v1549_v49, 8.507059e+37 }
 0x347   :  { %v1560_v43 = vsub.f32 %v1556_v6, %v1524_v28  ;;  %v1529_v27 = vadd.f32 %v1744_v31, %v1528_v60 }
 0x348   :  { %v1499_v44 = vadd.f32 %v1746_v34, %v1498_v55 }
 0x349   :  { %v1748_v17 = vpop.eup %1747  ;;  %1564 = vst.msk [vmem:[#allocation2 + $0x8] sm:$0xff] %vm1458_vm8, %v1560_v43  ;;  %v1533_v39 = vsel %vm1532_vm4, %v1744_v31, %v1529_v27 }
 0x34a   :  { %v1503_v52 = vsel %vm1502_vm5, %v1746_v34, %v1499_v44  ;;  %v1538_v42 = vsel %vm1535_vm6, %v1537_v53, %v1533_v39  ;;  %v1541_v20 = vmul.f32 %v1748_v17, %v1494_v40  ;;  %vm1546_vm9 = vweird.f32 %v1748_v17 }
 0x34b   :  { %v1508_v32 = vsel %vm1505_vm7, %v1507_v63, %v1503_v52  ;;  %v1539_v41 = vmul.f32 %v2676_v30, %v1538_v42  ;;  %vm1547_vm11 = vmor %vm1545_vm10, %vm1546_vm9 }
 0x34c   :  { %v1509_v35 = vmul.f32 %v2678_v0, %v1508_v32  ;;  %v1542_v51 = vsub.f32 1.0, %v1541_v20 }
 0x34d   :  { %v1561_v1 = vsub.f32 %v1557_v9, %v1539_v41 }
 0x34e   :  { %v1559_v59 = vsub.f32 %v1555_v50, %v1509_v35  ;;  %v1543_v21 = vmul.f32 %v1748_v17, %v1542_v51 }
 0x34f   :  { %1565 = vst.msk [vmem:[#allocation2 + $0x10] sm:$0xff] %vm1458_vm8, %v1561_v1 }
 0x350   :  { %1563 = vst.msk [vmem:[#allocation2] sm:$0xff] %vm1458_vm8, %v1559_v59  ;;  %v1544_v22 = vadd.f32 %v1748_v17, %v1543_v21 }
 0x352   :  { %v1548_v15 = vsel %vm1547_vm11, %v1748_v17, %v1544_v22 }
 0x353   :  { %v1553_v33 = vsel %vm1550_vm12, %v1552_v19, %v1548_v15 }
 0x354   :  { %v1554_v58 = vmul.f32 %v2684_v4, %v1553_v33 }
 0x356   :  { %v1562_v12 = vsub.f32 %v1558_v47, %v1554_v58 }
 0x358   :  { %1566 = vst.msk [vmem:[#allocation2 + $0x18] sm:$0xff] %vm1458_vm8, %v1562_v12 }
 0x359   :  { %1579 = dma.vmem_to_hbm [thread:$0]  %s1572_s14, 512, %s1574_s17, [#allocation3], %s1841_s20, %s1841_s20, %s1842_s21  }
 0x35a   :  { %1774 = dma.done.wait [#allocation3], 512  }
 0x35b   :  { %1775 = vsyncadd [#allocation3], 4294966784 }
 0x35c   :  { %1584 = vsyncpa [#allocation3], 1 }

</bundles_post_ra>
